<compile_context>
chip_gen: v6e
topology: v6e:2x2x1
jax: 0.10.0
libtpu: 0.0.40
codegen_flags: <defaults>
</compile_context>

<pallas_src>
import numpy as np
import jax
import jax.numpy as jnp
from jax import lax
from jax.experimental import pallas as pl
from jax.experimental.pallas import tpu as pltpu

# ----------------------------- "opt" constants --------------------------------
IM_CHAN = 4        # opt.im_chan
FM_CHAN = 32       # opt.fm_chan
IM_RES = 16        # opt.im_res (-> 1 conv_and_pool block)
RES_0 = 8          # opt.res_0  (spatial resolution after all blocks)
LRELU = 0.2        # opt.lrelu
HID = 128

H = W = IM_RES
HW = H * W                      # 256
S0 = RES_0 * RES_0              # 64

PACK = 4                        # images packed per lane group (PACK*FM_CHAN = 128)
LANES = PACK * FM_CHAN          # 128
CIN_P = PACK * IM_CHAN          # 16
KCOL = 9 * CIN_P                # 144 (im2col contraction depth)

GROUPS_PER_STEP = 16            # PACK-groups processed per feature grid step
HEAD_TM = 512                   # head batch tile (rows)


def _leaky(x):
    return jnp.where(x >= 0, x, LRELU * x)


# ------------------------------------------------------------------------------
# Kernel A (G PACK-groups per grid step):
#   composed (1x1 o 3x3) conv as a single bf16 MXU dot on im2col'd input,
#   + precomputed spatially-varying bias map, LeakyReLU,
#   AvgPool2d(2) as a bf16 pooling-matrix dot, LeakyReLU.
# Layout is transposed: rows = packed (image, channel) lanes of the old layout,
# cols = flattened spatial positions, so the pooled output (LANES, S0) flattens
# straight into PyTorch CHW order.
# ------------------------------------------------------------------------------
def _feature_kernel(x_ref, wct_ref, bias_ref, poolt_ref, feat_ref):
    g_per_step = x_ref.shape[0]            # static
    for g in range(g_per_step):
        x = x_ref[g]                                                # (KCOL, HW) bf16
        a = jnp.dot(wct_ref[...], x, preferred_element_type=jnp.float32)
        a = _leaky(a + bias_ref[...])                               # (LANES, HW) f32
        # Blur2d(None) == identity ; Dropout == identity (inference)
        pooled = jnp.dot(a.astype(jnp.bfloat16), poolt_ref[...],
                         preferred_element_type=jnp.float32)        # (LANES, S0)
        feat_ref[g] = _leaky(pooled)


# ------------------------------------------------------------------------------
# Kernel B: image2score MLP head, batch-tiled.  Final Linear(128, 1) is a VPU
# row-reduction (no degenerate N=1 MXU pass); b2 lives in SMEM.
# ------------------------------------------------------------------------------
def _head_kernel(x_ref, w1_ref, b1_ref, w2_ref, b2_ref, out_ref):
    h = jnp.dot(x_ref[...].astype(jnp.bfloat16), w1_ref[...],
                preferred_element_type=jnp.float32)
    h = _leaky(h + b1_ref[...])
    # Dropout == identity (inference)
    out_ref[...] = jnp.sum(h * w2_ref[...], axis=-1, keepdims=True) + b2_ref[0]


def discriminator_forward(img_nchw, kp):
    B = img_nchw.shape[0]
    nb = -(-B // PACK)                      # number of PACK-groups
    # Groups per grid step: amortize step overhead, but keep grid length >= 2
    # when possible so the "parallel" axis can shard across v7x's two TCs.
    G = 1 if nb == 1 else min(GROUPS_PER_STEP, max(1, nb // 2))
    nbp = -(-nb // G) * G                   # padded number of groups
    bp = nbp * PACK                         # padded batch

    # NCHW -> pad batch -> pack PACK images on the channel axis (image-major).
    x = img_nchw.astype(jnp.float32)
    x = jnp.pad(x, ((0, bp - B), (0, 0), (0, 0), (0, 0)))
    x = x.reshape(nbp, CIN_P, H, W)
    # im2col: zero-pad spatially, stack the 9 tap shifts on the channel axis,
    # spatial stays flattened on the lane axis -> (nbp, 144, 256), bf16.
    xp = jnp.pad(x, ((0, 0), (0, 0), (1, 1), (1, 1)))
    taps = [xp[:, :, dy:dy + H, dx:dx + W].reshape(nbp, CIN_P, HW)
            for dy in range(3) for dx in range(3)]
    x_t = jnp.concatenate(taps, axis=1).astype(jnp.bfloat16)

    feat = pl.pallas_call(
        _feature_kernel,
        out_shape=jax.ShapeDtypeStruct((nbp, LANES, S0), jnp.float32),
        grid_spec=pltpu.PrefetchScalarGridSpec(
            num_scalar_prefetch=0,
            grid=(nbp // G,),
            in_specs=[
                pl.BlockSpec((G, KCOL, HW), lambda n: (n, 0, 0)),
                pl.BlockSpec((LANES, KCOL), lambda n: (0, 0)),
                pl.BlockSpec((LANES, HW), lambda n: (0, 0)),
                pl.BlockSpec((HW, S0), lambda n: (0, 0)),
            ],
            out_specs=pl.BlockSpec((G, LANES, S0), lambda n: (n, 0, 0)),
        ),
        compiler_params=pltpu.CompilerParams(dimension_semantics=("parallel",)),
    )(x_t, kp["wct"], kp["bias"], kp["poolt"])

    # (nbp, LANES, S0) -> (bp, FM_CHAN*S0): contiguous, FREE reshape.  Row order
    # per image is c*S0 + s == PyTorch's CHW flatten order, so w1 is unpermuted.
    flat = feat.reshape(bp, FM_CHAN * S0)

    rows = bp
    tm = rows if rows <= HEAD_TM else HEAD_TM
    rows_p = -(-rows // tm) * tm
    if rows_p != rows:
        flat = jnp.pad(flat, ((0, rows_p - rows), (0, 0)))

    score = pl.pallas_call(
        _head_kernel,
        out_shape=jax.ShapeDtypeStruct((rows_p, 1), jnp.float32),
        grid_spec=pltpu.PrefetchScalarGridSpec(
            num_scalar_prefetch=0,
            grid=(rows_p // tm,),
            in_specs=[
                pl.BlockSpec((tm, FM_CHAN * S0), lambda i: (i, 0)),
                pl.BlockSpec((FM_CHAN * S0, HID), lambda i: (0, 0)),
                pl.BlockSpec((1, HID), lambda i: (0, 0)),
                pl.BlockSpec((1, HID), lambda i: (0, 0)),
                pl.BlockSpec(memory_space=pltpu.MemorySpace.SMEM),
            ],
            out_specs=pl.BlockSpec((tm, 1), lambda i: (i, 0)),
        ),
        compiler_params=pltpu.CompilerParams(dimension_semantics=("parallel",)),
    )(flat, kp["w1"], kp["b1"], kp["w2"], kp["b2"])
    return score[:B]


# ------------------------------------------------------------------------------
# Deterministic synthetic parameters (PyTorch-layout + kernel-layout views).
# ------------------------------------------------------------------------------
def _block_diag(w, g):
    """(i, j) -> (g*i, g*j) block-diagonal replication."""
    i, j = w.shape
    eye = jnp.eye(g, dtype=w.dtype)
    return (eye[:, None, :, None] * w[None, :, None, :]).reshape(g * i, g * j)


def init_params(key):
    ks = jax.random.split(key, 8)
    f32 = jnp.float32
    tp = {
        "wrgb": jax.random.normal(ks[0], (FM_CHAN, IM_CHAN, 1, 1), f32) / np.sqrt(IM_CHAN),
        "brgb": jax.random.normal(ks[1], (FM_CHAN,), f32) * 0.1,
        "w3":   jax.random.normal(ks[2], (FM_CHAN, FM_CHAN, 3, 3), f32) / np.sqrt(9 * FM_CHAN),
        "b3":   jax.random.normal(ks[3], (FM_CHAN,), f32) * 0.1,
        "w1":   jax.random.normal(ks[4], (HID, S0 * FM_CHAN), f32) / np.sqrt(S0 * FM_CHAN),
        "b1":   jax.random.normal(ks[5], (HID,), f32) * 0.1,
        "w2":   jax.random.normal(ks[6], (1, HID), f32) / np.sqrt(HID),
        "b2":   jax.random.normal(ks[7], (1,), f32) * 0.1,
    }

    # Composed conv weights: fold the 1x1 "from_rgb" conv into every 3x3 tap
    # (there is no nonlinearity between them), block-diag'd over PACK images.
    wrgb_k = tp["wrgb"][:, :, 0, 0].T                                           # (IM_CHAN, FM) in->out
    w3_k = jnp.transpose(tp["w3"], (2, 3, 1, 0)).reshape(9, FM_CHAN, FM_CHAN)   # (tap, in, out)
    wc = jnp.stack([_block_diag(wrgb_k @ w3_k[t], PACK) for t in range(9)])     # (9, CIN_P, LANES)
    wct = jnp.transpose(wc.reshape(KCOL, LANES))                                # (LANES, KCOL)

    # Spatially-varying composed bias MAP: conv3's zero padding is applied to
    # conv1(x) + brgb, so edge pixels see a different effective bias.
    dn = ("NCHW", "OIHW", "NCHW")
    hp = lax.Precision.HIGHEST
    brgb_map = jnp.broadcast_to(tp["brgb"].reshape(1, FM_CHAN, 1, 1), (1, FM_CHAN, H, W))
    bmap = lax.conv_general_dilated(brgb_map, tp["w3"], (1, 1), ((1, 1), (1, 1)),
                                    dimension_numbers=dn, precision=hp)
    bmap = (bmap + tp["b3"].reshape(1, -1, 1, 1))[0].reshape(FM_CHAN, HW)       # (FM, HW)

    # AvgPool2d(2) as a (HW, S0) pooling matrix (entries 0.25, exact in bf16).
    P = np.zeros((HW, S0), np.float32)
    for h in range(H):
        for w in range(W):
            P[h * W + w, (h // 2) * RES_0 + (w // 2)] = 0.25

    kp = {
        "wct":   wct.astype(jnp.bfloat16),                       # (128, 144)
        "bias":  jnp.tile(bmap, (PACK, 1)).astype(f32),          # (128, 256)
        "poolt": jnp.asarray(P, jnp.bfloat16),                   # (256, 64)
        "w1":    tp["w1"].T.astype(jnp.bfloat16),                # (2048, 128) CHW row order
        "b1":    tp["b1"].reshape(1, HID),                       # (1, 128) f32
        "w2":    tp["w2"],                                       # (1, 128) f32 row
        "b2":    tp["b2"],                                       # (1,) SMEM scalar
    }
    return tp, kp


# Pure-JAX reference (NCHW, PyTorch semantics) for validation.
def reference_forward(img, tp):
    dn = ("NCHW", "OIHW", "NCHW")
    hp = lax.Precision.HIGHEST
    f = lax.conv_general_dilated(img, tp["wrgb"], (1, 1), "VALID",
                                 dimension_numbers=dn, precision=hp)
    f = f + tp["brgb"].reshape(1, -1, 1, 1)
    f = lax.conv_general_dilated(f, tp["w3"], (1, 1), ((1, 1), (1, 1)),
                                 dimension_numbers=dn, precision=hp)
    f = f + tp["b3"].reshape(1, -1, 1, 1)
    f = _leaky(f)
    B = img.shape[0]
    f = f.reshape(B, FM_CHAN, RES_0, 2, RES_0, 2).mean(axis=(3, 5))
    f = _leaky(f)
    flat = f.reshape(B, -1)                           # CHW flatten order
    h = _leaky(jnp.dot(flat, tp["w1"].T, precision=hp) + tp["b1"])
    return jnp.dot(h, tp["w2"].T, precision=hp) + tp["b2"]


if __name__ == "__main__":
    key = jax.random.PRNGKey(0)
    kparams, kimg = jax.random.split(key)
    torch_params, kernel_params = init_params(kparams)

    img = jax.random.normal(kimg, (2, IM_CHAN, IM_RES, IM_RES), jnp.float32)

    out = jax.jit(discriminator_forward)(img, kernel_params)
    out = jax.block_until_ready(out)
    assert out.shape == (2, 1)

    ref = reference_forward(img, torch_params)
    # bf16 MXU operands (per perf review) -> <~1% end-to-end error vs the
    # HIGHEST-precision f32 reference; tolerance widened accordingly.
    np.testing.assert_allclose(np.asarray(out), np.asarray(ref), rtol=2e-2, atol=2e-2)
    print("KERNEL_OK")
</pallas_src>

<mosaic_0001>
module attributes {stable_mosaic.version = 11 : i64} {
  func.func @_feature_kernel(%arg0: i32, %arg1: memref<1x144x256xbf16, #tpu.memory_space<vmem>>, %arg2: memref<128x144xbf16, #tpu.memory_space<vmem>>, %arg3: memref<128x256xf32, #tpu.memory_space<vmem>>, %arg4: memref<256x64xbf16, #tpu.memory_space<vmem>>, %arg5: memref<1x128x64xf32, #tpu.memory_space<vmem>>) attributes {dimension_semantics = [#tpu.dimension_semantics<parallel>], iteration_bounds = array<i64: 1>, scalar_prefetch = 0 : i64, scratch_operands = 0 : i64, tpu.core_type = #tpu.core_type<tc>, window_params = [{transform_indices = @transform_0, window_bounds = array<i64: 1, 144, 256>}, {pipeline_mode = #tpu.pipeline_mode<synchronous>, transform_indices = @transform_1, window_bounds = array<i64: 128, 144>}, {pipeline_mode = #tpu.pipeline_mode<synchronous>, transform_indices = @transform_2, window_bounds = array<i64: 128, 256>}, {pipeline_mode = #tpu.pipeline_mode<synchronous>, transform_indices = @transform_3, window_bounds = array<i64: 256, 64>}, {transform_indices = @transform_4, window_bounds = array<i64: 1, 128, 64>}]} {
    %c0 = arith.constant 0 : index
    %c0_0 = arith.constant 0 : index
    %c0_1 = arith.constant 0 : index
    %0 = vector.load %arg1[%c0, %c0_0, %c0_1] : memref<1x144x256xbf16, #tpu.memory_space<vmem>>, vector<1x144x256xbf16>
    %1 = vector.shape_cast %0 : vector<1x144x256xbf16> to vector<144x256xbf16>
    %c0_2 = arith.constant 0 : index
    %c0_3 = arith.constant 0 : index
    %2 = vector.load %arg2[%c0_2, %c0_3] : memref<128x144xbf16, #tpu.memory_space<vmem>>, vector<128x144xbf16>
    %cst = arith.constant dense<0.000000e+00> : vector<128x256xf32>
    %3 = tpu.matmul %2, %1, %cst {dimension_numbers = #tpu.dot_dimension_numbers<[1], [0], [0], [1], [0, 0, 1, 1], [], []>} : vector<128x144xbf16>, vector<144x256xbf16>, vector<128x256xf32> -> vector<128x256xf32>
    %c0_4 = arith.constant 0 : index
    %c0_5 = arith.constant 0 : index
    %4 = vector.load %arg3[%c0_4, %c0_5] : memref<128x256xf32, #tpu.memory_space<vmem>>, vector<128x256xf32>
    %5 = arith.addf %3, %4 : vector<128x256xf32>
    %cst_6 = arith.constant 0.000000e+00 : f32
    %6 = vector.broadcast %cst_6 : f32 to vector<128x256xf32>
    %7 = arith.cmpf oge, %5, %6 : vector<128x256xf32>
    %cst_7 = arith.constant 2.000000e-01 : f32
    %8 = vector.broadcast %cst_7 : f32 to vector<128x256xf32>
    %9 = arith.mulf %8, %5 : vector<128x256xf32>
    %10 = arith.select %7, %5, %9 : vector<128x256xi1>, vector<128x256xf32>
    %11 = arith.truncf %10 : vector<128x256xf32> to vector<128x256xbf16>
    %c0_8 = arith.constant 0 : index
    %c0_9 = arith.constant 0 : index
    %12 = vector.load %arg4[%c0_8, %c0_9] : memref<256x64xbf16, #tpu.memory_space<vmem>>, vector<256x64xbf16>
    %cst_10 = arith.constant dense<0.000000e+00> : vector<128x64xf32>
    %13 = tpu.matmul %11, %12, %cst_10 {dimension_numbers = #tpu.dot_dimension_numbers<[1], [0], [0], [1], [0, 0, 1, 1], [], []>} : vector<128x256xbf16>, vector<256x64xbf16>, vector<128x64xf32> -> vector<128x64xf32>
    %cst_11 = arith.constant 0.000000e+00 : f32
    %14 = vector.broadcast %cst_11 : f32 to vector<128x64xf32>
    %15 = arith.cmpf oge, %13, %14 : vector<128x64xf32>
    %cst_12 = arith.constant 2.000000e-01 : f32
    %16 = vector.broadcast %cst_12 : f32 to vector<128x64xf32>
    %17 = arith.mulf %16, %13 : vector<128x64xf32>
    %18 = arith.select %15, %13, %17 : vector<128x64xi1>, vector<128x64xf32>
    %c0_13 = arith.constant 0 : index
    %c0_14 = arith.constant 0 : index
    %c0_15 = arith.constant 0 : index
    %19 = vector.load %arg5[%c0_13, %c0_14, %c0_15] : memref<1x128x64xf32, #tpu.memory_space<vmem>>, vector<1x128x64xf32>
    %20 = vector.shape_cast %19 : vector<1x128x64xf32> to vector<128x64xf32>
    %21 = vector.shape_cast %18 : vector<128x64xf32> to vector<1x128x64xf32>
    tpu.vector_store %arg5[%c0_13, %c0_14, %c0_15], %21 {strides = array<i32>} : memref<1x128x64xf32, #tpu.memory_space<vmem>>, vector<1x128x64xf32>,
    return
  }
  func.func @transform_0(%arg0: i32) -> (i32, i32, i32) {
    %c0_i32 = arith.constant 0 : i32
    %c0_i32_0 = arith.constant 0 : i32
    %c0_i32_1 = arith.constant 0 : i32
    return %arg0, %c0_i32, %c0_i32_0 : i32, i32, i32
  }
  func.func @transform_1(%arg0: i32) -> (i32, i32) {
    %c0_i32 = arith.constant 0 : i32
    %c0_i32_0 = arith.constant 0 : i32
    %c0_i32_1 = arith.constant 0 : i32
    return %c0_i32, %c0_i32_0 : i32, i32
  }
  func.func @transform_2(%arg0: i32) -> (i32, i32) {
    %c0_i32 = arith.constant 0 : i32
    %c0_i32_0 = arith.constant 0 : i32
    %c0_i32_1 = arith.constant 0 : i32
    return %c0_i32, %c0_i32_0 : i32, i32
  }
  func.func @transform_3(%arg0: i32) -> (i32, i32) {
    %c0_i32 = arith.constant 0 : i32
    %c0_i32_0 = arith.constant 0 : i32
    %c0_i32_1 = arith.constant 0 : i32
    return %c0_i32, %c0_i32_0 : i32, i32
  }
  func.func @transform_4(%arg0: i32) -> (i32, i32, i32) {
    %c0_i32 = arith.constant 0 : i32
    %c0_i32_0 = arith.constant 0 : i32
    %c0_i32_1 = arith.constant 0 : i32
    return %arg0, %c0_i32, %c0_i32_0 : i32, i32, i32
  }
}

module attributes {stable_mosaic.version = 11 : i64} {
  func.func @_head_kernel(%arg0: i32, %arg1: memref<4x2048xf32, #tpu.memory_space<vmem>>, %arg2: memref<2048x128xbf16, #tpu.memory_space<vmem>>, %arg3: memref<1x128xf32, #tpu.memory_space<vmem>>, %arg4: memref<1x128xf32, #tpu.memory_space<vmem>>, %arg5: memref<1xf32, #tpu.memory_space<smem>>, %arg6: memref<4x1xf32, #tpu.memory_space<vmem>>) attributes {dimension_semantics = [#tpu.dimension_semantics<parallel>], iteration_bounds = array<i64: 1>, scalar_prefetch = 0 : i64, scratch_operands = 0 : i64, tpu.core_type = #tpu.core_type<tc>, window_params = [{transform_indices = @transform_0, window_bounds = array<i64: 4, 2048>}, {pipeline_mode = #tpu.pipeline_mode<synchronous>, transform_indices = @transform_1, window_bounds = array<i64: 2048, 128>}, {pipeline_mode = #tpu.pipeline_mode<synchronous>, transform_indices = @transform_2, window_bounds = array<i64: 1, 128>}, {pipeline_mode = #tpu.pipeline_mode<synchronous>, transform_indices = @transform_3, window_bounds = array<i64: 1, 128>}, {transform_indices = @transform_4, window_bounds = array<i64: 1>}, {transform_indices = @transform_5, window_bounds = array<i64: 4, 1>}]} {
    %c0 = arith.constant 0 : index
    %c0_0 = arith.constant 0 : index
    %0 = vector.load %arg1[%c0, %c0_0] : memref<4x2048xf32, #tpu.memory_space<vmem>>, vector<4x2048xf32>
    %1 = arith.truncf %0 : vector<4x2048xf32> to vector<4x2048xbf16>
    %c0_1 = arith.constant 0 : index
    %c0_2 = arith.constant 0 : index
    %2 = vector.load %arg2[%c0_1, %c0_2] : memref<2048x128xbf16, #tpu.memory_space<vmem>>, vector<2048x128xbf16>
    %cst = arith.constant dense<0.000000e+00> : vector<4x128xf32>
    %3 = tpu.matmul %1, %2, %cst {dimension_numbers = #tpu.dot_dimension_numbers<[1], [0], [0], [1], [0, 0, 1, 1], [], []>} : vector<4x2048xbf16>, vector<2048x128xbf16>, vector<4x128xf32> -> vector<4x128xf32>
    %c0_3 = arith.constant 0 : index
    %c0_4 = arith.constant 0 : index
    %4 = vector.load %arg3[%c0_3, %c0_4] : memref<1x128xf32, #tpu.memory_space<vmem>>, vector<1x128xf32>
    %5 = vector.broadcast %4 : vector<1x128xf32> to vector<4x128xf32>
    %6 = arith.addf %3, %5 : vector<4x128xf32>
    %cst_5 = arith.constant 0.000000e+00 : f32
    %7 = vector.broadcast %cst_5 : f32 to vector<4x128xf32>
    %8 = arith.cmpf oge, %6, %7 : vector<4x128xf32>
    %cst_6 = arith.constant 2.000000e-01 : f32
    %9 = vector.broadcast %cst_6 : f32 to vector<4x128xf32>
    %10 = arith.mulf %9, %6 : vector<4x128xf32>
    %11 = arith.select %8, %6, %10 : vector<4x128xi1>, vector<4x128xf32>
    %c0_7 = arith.constant 0 : index
    %c0_8 = arith.constant 0 : index
    %12 = vector.load %arg4[%c0_7, %c0_8] : memref<1x128xf32, #tpu.memory_space<vmem>>, vector<1x128xf32>
    %13 = vector.broadcast %12 : vector<1x128xf32> to vector<4x128xf32>
    %14 = arith.mulf %11, %13 : vector<4x128xf32>
    %cst_9 = arith.constant dense<0.000000e+00> : vector<4xf32>
    %15 = vector.multi_reduction <add>, %14, %cst_9 [1] : vector<4x128xf32> to vector<4xf32>
    %16 = vector.shape_cast %15 : vector<4xf32> to vector<4x1xf32>
    %c0_10 = arith.constant 0 : index
    %17 = memref.load %arg5[%c0_10] : memref<1xf32, #tpu.memory_space<smem>>
    %18 = vector.broadcast %17 : f32 to vector<4x1xf32>
    %19 = arith.addf %16, %18 : vector<4x1xf32>
    %c0_11 = arith.constant 0 : index
    %c0_12 = arith.constant 0 : index
    %20 = vector.load %arg6[%c0_11, %c0_12] : memref<4x1xf32, #tpu.memory_space<vmem>>, vector<4x1xf32>
    tpu.vector_store %arg6[%c0_11, %c0_12], %19 {strides = array<i32>} : memref<4x1xf32, #tpu.memory_space<vmem>>, vector<4x1xf32>,
    return
  }
  func.func @transform_0(%arg0: i32) -> (i32, i32) {
    %c0_i32 = arith.constant 0 : i32
    %c0_i32_0 = arith.constant 0 : i32
    return %arg0, %c0_i32 : i32, i32
  }
  func.func @transform_1(%arg0: i32) -> (i32, i32) {
    %c0_i32 = arith.constant 0 : i32
    %c0_i32_0 = arith.constant 0 : i32
    %c0_i32_1 = arith.constant 0 : i32
    return %c0_i32, %c0_i32_0 : i32, i32
  }
  func.func @transform_2(%arg0: i32) -> (i32, i32) {
    %c0_i32 = arith.constant 0 : i32
    %c0_i32_0 = arith.constant 0 : i32
    %c0_i32_1 = arith.constant 0 : i32
    return %c0_i32, %c0_i32_0 : i32, i32
  }
  func.func @transform_3(%arg0: i32) -> (i32, i32) {
    %c0_i32 = arith.constant 0 : i32
    %c0_i32_0 = arith.constant 0 : i32
    %c0_i32_1 = arith.constant 0 : i32
    return %c0_i32, %c0_i32_0 : i32, i32
  }
  func.func @transform_4(%arg0: i32) -> i32 {
    %c0_i32 = arith.constant 0 : i32
    %c0_i32_0 = arith.constant 0 : i32
    return %c0_i32 : i32
  }
  func.func @transform_5(%arg0: i32) -> (i32, i32) {
    %c0_i32 = arith.constant 0 : i32
    %c0_i32_0 = arith.constant 0 : i32
    return %arg0, %c0_i32 : i32, i32
  }
}

</mosaic_0001>

<bundles_post_ra>
// kernel: discriminator_forward.2
= control target key start
LH: loop header
LB: loop body
LE: loop exit
PB: predicated region body
PF: predicated region fallthrough
CT: control target
= control target key end

     0   :  { %vm246_vm0 = vcmask 130048   ;;  %s1322_s0 = inlined_call_operand.vmem [shape: bf16[1,144,256], index: 0, kind: input, shape index: {}]   ;;  %s1323_s1 = inlined_call_operand.vmem [shape: bf16[128,144], index: 1, kind: input, shape index: {}]   ;;  %s1324_s3 = inlined_call_operand.vmem [shape: bf16[256,64], index: 3, kind: input, shape index: {}]   ;;  %s1325_s2 = inlined_call_operand.vmem [shape: f32[128,256], index: 2, kind: input, shape index: {}]   ;;  %s1326_s4 = inlined_call_operand.vmem [shape: f32[1,128,64], index: 4, kind: output, shape index: {}]  }
   0x1   :  { %v912_v0 = vld [vmem:[%s1322_s0 + $0x74] ss:$8 sps:$4 sm:$0xff]   ;;  %v914_v1 = vld [vmem:[%s1322_s0 + $0x70] ss:$8 sps:$4 sm:$0xff]   ;;  %v915_v2 = vld [vmem:[%s1322_s0 + $0x64] ss:$8 sps:$4 sm:$0xff]  }
   0x2   :  { %271 = vmatprep.subr.bf16.mxu0 %v912_v0  ;;  %v917_v3 = vld [vmem:[%s1322_s0 + $0x60] ss:$8 sps:$4 sm:$0xff]   ;;  %v918_v4 = vld [vmem:[%s1322_s0 + $0x54] ss:$8 sps:$4 sm:$0xff]   ;;  %v920_v5 = vld [vmem:[%s1322_s0 + $0x50] ss:$8 sps:$4 sm:$0xff]  }
   0x3   :  { %272 = vmatpush1.bf16.msra.mxu0 %v914_v1  ;;  %v921_v6 = vld [vmem:[%s1322_s0 + $0x44] ss:$8 sps:$4 sm:$0xff]   ;;  %v923_v7 = vld [vmem:[%s1322_s0 + $0x40] ss:$8 sps:$4 sm:$0xff]   ;;  %v924_v8 = vld [vmem:[%s1322_s0 + $0x34] ss:$8 sps:$4 sm:$0xff]  }
   0x4   :  { %273 = vmatprep.subr.bf16.mxu0 %v915_v2  ;;  %v941_v9 = vld [vmem:[%s1323_s1 + $0x4] ss:$8 sps:$4 sm:$0xff]   ;;  %v926_v10 = vld [vmem:[%s1322_s0 + $0x30] ss:$8 sps:$4 sm:$0xff]   ;;  %v929_v12 = vld [vmem:[%s1322_s0 + $0x20] ss:$8 sps:$4 sm:$0xff]  }
   0x5   :  { %824 = vmatprep.mubr.msk.bf16.mxu0 %vm246_vm0, %v941_v9  ;;  %v927_v11 = vld [vmem:[%s1322_s0 + $0x24] ss:$8 sps:$4 sm:$0xff]   ;;  %v930_v13 = vld [vmem:[%s1322_s0 + $0x14] ss:$8 sps:$4 sm:$0xff]   ;;  %v932_v14 = vld [vmem:[%s1322_s0 + $0x10] ss:$8 sps:$4 sm:$0xff]  }
   0x6   :  { %v933_v15 = vld [vmem:[%s1322_s0 + $0x4] ss:$8 sps:$4 sm:$0xff]   ;;  %v963_v16 = vld [vmem:[%s1324_s3 + $0x78] sm:$0xff]   ;;  %v935_v18 = vld [vmem:[%s1322_s0] ss:$8 sps:$4 sm:$0xff]  }
   0x7   :  { %274 = vmatpush1.bf16.msra.mxu0 %v917_v3  ;;  %v964_v17 = vld [vmem:[%s1324_s3 + $0x38] sm:$0xff]   ;;  %848 = vmatprep.subr.bf16.mxu1 %v963_v16  ;;  %v965_v19 = vld [vmem:[%s1324_s3 + $0x70] sm:$0xff]   ;;  %v967_v21 = vld [vmem:[%s1324_s3 + $0x68] sm:$0xff]  }
   0x8   :  { %275 = vmatprep.subr.bf16.mxu0 %v918_v4  ;;  %849 = vmatpush3.bf16.msra.mxu1 %v964_v17  ;;  %v966_v20 = vld [vmem:[%s1324_s3 + $0x30] sm:$0xff]   ;;  %v936_v22 = vld [vmem:[%s1322_s0 + $0x84] ss:$8 sps:$4 sm:$0xff]   ;;  %v938_v24 = vld [vmem:[%s1322_s0 + $0x80] ss:$8 sps:$4 sm:$0xff]  }
   0x9   :  { %850 = vmatprep.subr.bf16.mxu1 %v965_v19  ;;  %v968_v23 = vld [vmem:[%s1324_s3 + $0x28] sm:$0xff]   ;;  %v969_v25 = vld [vmem:[%s1324_s3 + $0x60] sm:$0xff]   ;;  %v942_v28 = vld [vmem:[%s1323_s1 + $0x14] ss:$8 sps:$4 sm:$0xff]  }
   0xa   :  { %v939_v26 = vld [vmem:[%s1323_s1] ss:$8 sps:$4 sm:$0xff]   ;;  %v971_v29 = vld [vmem:[%s1324_s3 + $0x58] sm:$0xff]   ;;  %v945_v31 = vld [vmem:[%s1323_s1 + $0x24] ss:$8 sps:$4 sm:$0xff]  }
   0xb   :  { %276 = vmatpush1.bf16.msra.mxu0 %v920_v5  ;;  %v970_v27 = vld [vmem:[%s1324_s3 + $0x20] sm:$0xff]   ;;  %v944_v30 = vld [vmem:[%s1323_s1 + $0x10] ss:$8 sps:$4 sm:$0xff]   ;;  %v948_v33 = vld [vmem:[%s1323_s1 + $0x34] ss:$8 sps:$4 sm:$0xff]  }
   0xc   :  { %277 = vmatprep.subr.bf16.mxu0 %v921_v6  ;;  %851 = vmatpush3.bf16.msra.mxu1 %v966_v20  ;;  %v947_v32 = vld [vmem:[%s1323_s1 + $0x20] ss:$8 sps:$4 sm:$0xff]   ;;  %v950_v34 = vld [vmem:[%s1323_s1 + $0x30] ss:$8 sps:$4 sm:$0xff]   ;;  %v951_v35 = vld [vmem:[%s1323_s1 + $0x44] ss:$8 sps:$4 sm:$0xff]  }
   0xd   :  { %852 = vmatprep.subr.bf16.mxu1 %v967_v21  ;;  %v953_v36 = vld [vmem:[%s1323_s1 + $0x40] ss:$8 sps:$4 sm:$0xff]   ;;  %v954_v37 = vld [vmem:[%s1323_s1 + $0x54] ss:$8 sps:$4 sm:$0xff]   ;;  %v956_v38 = vld [vmem:[%s1323_s1 + $0x50] ss:$8 sps:$4 sm:$0xff]  }
   0xe   :  { %v957_v39 = vld [vmem:[%s1323_s1 + $0x64] ss:$8 sps:$4 sm:$0xff]   ;;  %v959_v40 = vld [vmem:[%s1323_s1 + $0x60] ss:$8 sps:$4 sm:$0xff]   ;;  %v960_v41 = vld [vmem:[%s1323_s1 + $0x74] ss:$8 sps:$4 sm:$0xff]  }
   0xf   :  { %278 = vmatpush1.bf16.msra.mxu0 %v923_v7  ;;  %v962_v42 = vld [vmem:[%s1323_s1 + $0x70] ss:$8 sps:$4 sm:$0xff]   ;;  %v975_v46 = vld [vmem:[%s1324_s3 + $0x48] sm:$0xff]   ;;  %v977_v48 = vld [vmem:[%s1324_s3 + $0x40] sm:$0xff]  }
  0x10   :  { %279 = vmatprep.subr.bf16.mxu0 %v924_v8  ;;  %853 = vmatpush3.bf16.msra.mxu1 %v968_v23  ;;  %v972_v43 = vld [vmem:[%s1324_s3 + $0x18] sm:$0xff]   ;;  %v973_v44 = vld [vmem:[%s1324_s3 + $0x50] sm:$0xff]   ;;  %v976_v47 = vld [vmem:[%s1324_s3 + $0x8] sm:$0xff]  }
  0x11   :  { %854 = vmatprep.subr.bf16.mxu1 %v969_v25  ;;  %v974_v45 = vld [vmem:[%s1324_s3 + $0x10] sm:$0xff]   ;;  %v978_v49 = vld [vmem:[%s1324_s3] sm:$0xff]   ;;  %v53_v51 = vld [vmem:[%s1325_s2 + $0x8] sm:$0xff] }
  0x12   :  { %v52_v52 = vld [vmem:[%s1325_s2] sm:$0xff]  ;;  %v54_v54 = vld [vmem:[%s1325_s2 + $0x10] sm:$0xff]  ;;  %v55_v58 = vld [vmem:[%s1325_s2 + $0x18] sm:$0xff] }
  0x13   :  { %280 = vmatpush1.bf16.msra.mxu0 %v926_v10  ;;  %v57_v2 = vld [vmem:[%s1325_s2 + $0x28] sm:$0xff]  ;;  %v56_v4 = vld [vmem:[%s1325_s2 + $0x20] sm:$0xff]  ;;  %v58_v6 = vld [vmem:[%s1325_s2 + $0x30] sm:$0xff] }
  0x14   :  { %281 = vmatprep.subr.bf16.mxu0 %v927_v11  ;;  %855 = vmatpush3.bf16.msra.mxu1 %v970_v27 }
  0x15   :  { %856 = vmatprep.subr.bf16.mxu1 %v971_v29 }
  0x17   :  { %282 = vmatpush1.bf16.msra.mxu0 %v929_v12 }
  0x18   :  { %283 = vmatprep.subr.bf16.mxu0 %v930_v13  ;;  %857 = vmatpush3.bf16.msra.mxu1 %v972_v43  ;;  %v59_v13 = vld [vmem:[%s1325_s2 + $0x38] sm:$0xff] }
  0x19   :  { %858 = vmatprep.subr.bf16.mxu1 %v973_v44 }
  0x1b   :  { %284 = vmatpush1.bf16.msra.mxu0 %v932_v14 }
  0x1c   :  { %285 = vmatprep.subr.bf16.mxu0 %v933_v15  ;;  %859 = vmatpush3.bf16.msra.mxu1 %v974_v45 }
  0x1d   :  { %860 = vmatprep.subr.bf16.mxu1 %v975_v46  ;;  %v65_v46 = vld [vmem:[%s1325_s2 + $0x68] sm:$0xff] }
  0x1f   :  { %286 = vmatpush1.bf16.msra.mxu0 %v935_v18 }
  0x20   :  { %301 = vmatprep.subr.bf16.mxu0 %v936_v22  ;;  %861 = vmatpush3.bf16.msra.mxu1 %v976_v47 }
  0x21   :  { %862 = vmatprep.subr.bf16.mxu1 %v977_v48  ;;  %v64_v48 = vld [vmem:[%s1325_s2 + $0x60] sm:$0xff] }
  0x23   :  { %302 = vmatpush2.bf16.msra.mxu0 %v938_v24  ;;  %v61_v24 = vld [vmem:[%s1325_s2 + $0x48] sm:$0xff] }
  0x24   :  { %863 = vmatpush3.bf16.msra.mxu1 %v978_v49 }
  0x26   :  { %304 = vmatmul.mubr.bf16.vlgmr.msra.gmra.mxu0 %v939_v26  ;;  %v60_v26 = vld [vmem:[%s1325_s2 + $0x40] sm:$0xff] }
  0x27   :  { %825 = vmatprep.mubr.msk.bf16.mxu0 %vm246_vm0, %v942_v28  ;;  %v62_v28 = vld [vmem:[%s1325_s2 + $0x50] sm:$0xff] }
  0x2e   :  { %314 = vmatmul.mubr.bf16.gmra.mxu0 %v944_v30 }
  0x2f   :  { %826 = vmatprep.mubr.msk.bf16.mxu0 %vm246_vm0, %v945_v31 }
  0x36   :  { %324 = vmatmul.mubr.bf16.gmra.mxu0 %v947_v32 }
  0x37   :  { %827 = vmatprep.mubr.msk.bf16.mxu0 %vm246_vm0, %v948_v33 }
  0x3e   :  { %334 = vmatmul.mubr.bf16.gmra.mxu0 %v950_v34 }
  0x3f   :  { %828 = vmatprep.mubr.msk.bf16.mxu0 %vm246_vm0, %v951_v35  ;;  %v63_v35 = vld [vmem:[%s1325_s2 + $0x58] sm:$0xff] }
  0x46   :  { %344 = vmatmul.mubr.bf16.gmra.mxu0 %v953_v36 }
  0x47   :  { %829 = vmatprep.mubr.msk.bf16.mxu0 %vm246_vm0, %v954_v37 }
  0x4e   :  { %354 = vmatmul.mubr.bf16.gmra.mxu0 %v956_v38 }
  0x4f   :  { %830 = vmatprep.mubr.msk.bf16.mxu0 %vm246_vm0, %v957_v39 }
  0x56   :  { %364 = vmatmul.mubr.bf16.gmra.mxu0 %v959_v40 }
  0x57   :  { %831 = vmatprep.mubr.msk.bf16.mxu0 %vm246_vm0, %v960_v41 }
  0x5e   :  { %374 = vmatmul.mubr.bf16.gmra.mxu0 %v962_v42 }
  0xe6   :  { %v305_v50 = vpop.f32.mrf.mxu0 }
  0xe7   :  { %v306_v56 = vadd.f32 %v305_v50, %v52_v52  ;;  %v66_v50 = vld [vmem:[%s1325_s2 + $0x70] sm:$0xff] }
  0xe8   :  { %v307_v53 = vpop.f32.mrf.mxu0 }
  0xe9   :  { %v308_v55 = vadd.f32 %v307_v53, %v53_v51  ;;  %v416_v0 = vmul.f32 0.2, %v306_v56  ;;  %vm384_vm3 = vcmp.ge.f32.partialorder %v306_v56, 0.0 }
  0xea   :  { %v309_v57 = vpop.f32.mrf.mxu0 }
  0xeb   :  { %v310_v59 = vadd.f32 %v309_v57, %v54_v54  ;;  %v417_v61 = vmul.f32 0.2, %v308_v55  ;;  %vm385_vm2 = vcmp.ge.f32.partialorder %v308_v55, 0.0  ;;  %v448_v15 = vsel %vm384_vm3, %v306_v56, %v416_v0  ;;  %v67_v57 = vld [vmem:[%s1325_s2 + $0x78] sm:$0xff] }
  0xec   :  { %v311_v60 = vpop.f32.mrf.mxu0 }
  0xed   :  { %vm386_vm1 = vcmp.ge.f32.partialorder %v310_v59, 0.0  ;;  %v418_v62 = vmul.f32 0.2, %v310_v59  ;;  %v312_v63 = vadd.f32 %v311_v60, %v55_v58  ;;  %v449_v9 = vsel %vm385_vm2, %v308_v55, %v417_v61 }
  0xee   :  { %v315_v1 = vpop.f32.mrf.mxu0 }
  0xef   :  { %v419_v3 = vmul.f32 0.2, %v312_v63  ;;  %vm387_vm4 = vcmp.ge.f32.partialorder %v312_v63, 0.0  ;;  %v450_v7 = vsel %vm386_vm1, %v310_v59, %v418_v62  ;;  %v316_v11 = vadd.f32 %v315_v1, %v56_v4  ;;  %v69_v4 = vld [vmem:[%s1325_s2 + $0x88] sm:$0xff] }
  0xf0   :  { %v317_v5 = vpop.f32.mrf.mxu0  ;;  %v480_v17 = vpack.c.bf16 %v450_v7, %v448_v15  ;;  %v71_v15 = vld [vmem:[%s1325_s2 + $0x98] sm:$0xff] }
  0xf1   :  { %v318_v8 = vadd.f32 %v317_v5, %v57_v2  ;;  %v451_v10 = vsel %vm387_vm4, %v312_v63, %v419_v3  ;;  %v420_v22 = vmul.f32 0.2, %v316_v11  ;;  %vm388_vm7 = vcmp.ge.f32.partialorder %v316_v11, 0.0 }
  0xf2   :  { %v319_v12 = vpop.f32.mrf.mxu0  ;;  %v481_v14 = vpack.c.bf16 %v451_v10, %v449_v9 }
  0xf3   :  { %v320_v16 = vadd.f32 %v319_v12, %v58_v6  ;;  %v421_v19 = vmul.f32 0.2, %v318_v8  ;;  %vm389_vm6 = vcmp.ge.f32.partialorder %v318_v8, 0.0  ;;  %v452_v37 = vsel %vm388_vm7, %v316_v11, %v420_v22  ;;  %v68_v6 = vld [vmem:[%s1325_s2 + $0x80] sm:$0xff] }
  0xf4   :  { %v321_v18 = vpop.f32.mrf.mxu0  ;;  %656 = vmatprep.mubr.bf16.mxu1 %v481_v14 }
  0xf5   :  { %vm390_vm5 = vcmp.ge.f32.partialorder %v320_v16, 0.0  ;;  %v422_v20 = vmul.f32 0.2, %v320_v16  ;;  %v322_v21 = vadd.f32 %v321_v18, %v59_v13  ;;  %657 = vmatmul.mubr.bf16.vlgmr.msra.gmra.mxu1 %v480_v17  ;;  %v453_v31 = vsel %vm389_vm6, %v318_v8, %v421_v19  ;;  %v70_v8 = vld [vmem:[%s1325_s2 + $0x90] sm:$0xff] }
  0xf6   :  { %v325_v23 = vpop.f32.mrf.mxu0 }
  0xf7   :  { %vm391_vm8 = vcmp.ge.f32.partialorder %v322_v21, 0.0  ;;  %v423_v25 = vmul.f32 0.2, %v322_v21  ;;  %v454_v29 = vsel %vm390_vm5, %v320_v16, %v422_v20  ;;  %v326_v33 = vadd.f32 %v325_v23, %v60_v26  ;;  %v73_v26 = vld [vmem:[%s1325_s2 + $0xa8] sm:$0xff] }
  0xf8   :  { %v327_v27 = vpop.f32.mrf.mxu0  ;;  %v482_v39 = vpack.c.bf16 %v454_v29, %v452_v37  ;;  %v75_v37 = vld [vmem:[%s1325_s2 + $0xb8] sm:$0xff] }
  0xf9   :  { %v328_v30 = vadd.f32 %v327_v27, %v61_v24  ;;  %v455_v32 = vsel %vm391_vm8, %v322_v21, %v423_v25  ;;  %v424_v44 = vmul.f32 0.2, %v326_v33  ;;  %vm392_vm11 = vcmp.ge.f32.partialorder %v326_v33, 0.0 }
  0xfa   :  { %v329_v34 = vpop.f32.mrf.mxu0  ;;  %v483_v36 = vpack.c.bf16 %v455_v32, %v453_v31 }
  0xfb   :  { %v330_v38 = vadd.f32 %v329_v34, %v62_v28  ;;  %v425_v41 = vmul.f32 0.2, %v328_v30  ;;  %vm393_vm10 = vcmp.ge.f32.partialorder %v328_v30, 0.0  ;;  %v456_v59 = vsel %vm392_vm11, %v326_v33, %v424_v44  ;;  %v72_v28 = vld [vmem:[%s1325_s2 + $0xa0] sm:$0xff] }
  0xfc   :  { %v331_v40 = vpop.f32.mrf.mxu0  ;;  %664 = vmatprep.mubr.bf16.mxu1 %v483_v36 }
  0xfd   :  { %vm394_vm9 = vcmp.ge.f32.partialorder %v330_v38, 0.0  ;;  %v426_v42 = vmul.f32 0.2, %v330_v38  ;;  %v332_v43 = vadd.f32 %v331_v40, %v63_v35  ;;  %665 = vmatmul.mubr.bf16.gmra.mxu1 %v482_v39  ;;  %v457_v53 = vsel %vm393_vm10, %v328_v30, %v425_v41  ;;  %v74_v30 = vld [vmem:[%s1325_s2 + $0xb0] sm:$0xff] }
  0xfe   :  { %v335_v45 = vpop.f32.mrf.mxu0 }
  0xff   :  { %vm395_vm12 = vcmp.ge.f32.partialorder %v332_v43, 0.0  ;;  %v427_v47 = vmul.f32 0.2, %v332_v43  ;;  %v458_v51 = vsel %vm394_vm9, %v330_v38, %v426_v42  ;;  %v336_v55 = vadd.f32 %v335_v45, %v64_v48  ;;  %v77_v48 = vld [vmem:[%s1325_s2 + $0xc8] sm:$0xff] }
 0x100   :  { %v337_v49 = vpop.f32.mrf.mxu0  ;;  %v484_v61 = vpack.c.bf16 %v458_v51, %v456_v59  ;;  %v79_v59 = vld [vmem:[%s1325_s2 + $0xd8] sm:$0xff] }
 0x101   :  { %v338_v52 = vadd.f32 %v337_v49, %v65_v46  ;;  %v459_v54 = vsel %vm395_vm12, %v332_v43, %v427_v47  ;;  %v428_v2 = vmul.f32 0.2, %v336_v55  ;;  %vm396_vm15 = vcmp.ge.f32.partialorder %v336_v55, 0.0 }
 0x102   :  { %v339_v56 = vpop.f32.mrf.mxu0  ;;  %v485_v58 = vpack.c.bf16 %v459_v54, %v457_v53 }
 0x103   :  { %v340_v60 = vadd.f32 %v339_v56, %v66_v50  ;;  %v429_v63 = vmul.f32 0.2, %v338_v52  ;;  %vm397_vm14 = vcmp.ge.f32.partialorder %v338_v52, 0.0  ;;  %v460_v17 = vsel %vm396_vm15, %v336_v55, %v428_v2  ;;  %v76_v50 = vld [vmem:[%s1325_s2 + $0xc0] sm:$0xff] }
 0x104   :  { %v341_v62 = vpop.f32.mrf.mxu0  ;;  %672 = vmatprep.mubr.bf16.mxu1 %v485_v58 }
 0x105   :  { %vm398_vm13 = vcmp.ge.f32.partialorder %v340_v60, 0.0  ;;  %v430_v0 = vmul.f32 0.2, %v340_v60  ;;  %v342_v1 = vadd.f32 %v341_v62, %v67_v57  ;;  %673 = vmatmul.mubr.bf16.gmra.mxu1 %v484_v61  ;;  %v461_v11 = vsel %vm397_vm14, %v338_v52, %v429_v63  ;;  %v78_v52 = vld [vmem:[%s1325_s2 + $0xd0] sm:$0xff] }
 0x106   :  { %v345_v3 = vpop.f32.mrf.mxu0 }
 0x107   :  { %vm399_vm0 = vcmp.ge.f32.partialorder %v342_v1, 0.0  ;;  %v431_v5 = vmul.f32 0.2, %v342_v1  ;;  %v462_v9 = vsel %vm398_vm13, %v340_v60, %v430_v0  ;;  %v346_v13 = vadd.f32 %v345_v3, %v68_v6  ;;  %v81_v6 = vld [vmem:[%s1325_s2 + $0xe8] sm:$0xff] }
 0x108   :  { %v347_v7 = vpop.f32.mrf.mxu0  ;;  %v486_v19 = vpack.c.bf16 %v462_v9, %v460_v17  ;;  %v83_v17 = vld [vmem:[%s1325_s2 + $0xf8] sm:$0xff] }
 0x109   :  { %v348_v10 = vadd.f32 %v347_v7, %v69_v4  ;;  %v463_v12 = vsel %vm399_vm0, %v342_v1, %v431_v5  ;;  %v432_v24 = vmul.f32 0.2, %v346_v13  ;;  %vm400_vm3 = vcmp.ge.f32.partialorder %v346_v13, 0.0 }
 0x10a   :  { %v349_v14 = vpop.f32.mrf.mxu0  ;;  %v487_v16 = vpack.c.bf16 %v463_v12, %v461_v11 }
 0x10b   :  { %v350_v18 = vadd.f32 %v349_v14, %v70_v8  ;;  %v433_v21 = vmul.f32 0.2, %v348_v10  ;;  %vm401_vm2 = vcmp.ge.f32.partialorder %v348_v10, 0.0  ;;  %v464_v39 = vsel %vm400_vm3, %v346_v13, %v432_v24  ;;  %v80_v8 = vld [vmem:[%s1325_s2 + $0xe0] sm:$0xff] }
 0x10c   :  { %v351_v20 = vpop.f32.mrf.mxu0  ;;  %680 = vmatprep.mubr.bf16.mxu1 %v487_v16 }
 0x10d   :  { %vm402_vm1 = vcmp.ge.f32.partialorder %v350_v18, 0.0  ;;  %v434_v22 = vmul.f32 0.2, %v350_v18  ;;  %v352_v23 = vadd.f32 %v351_v20, %v71_v15  ;;  %681 = vmatmul.mubr.bf16.gmra.mxu1 %v486_v19  ;;  %v465_v33 = vsel %vm401_vm2, %v348_v10, %v433_v21  ;;  %v82_v10 = vld [vmem:[%s1325_s2 + $0xf0] sm:$0xff] }
 0x10e   :  { %v355_v25 = vpop.f32.mrf.mxu0  ;;  %vm769_vm2 = vcmask 523264  }
 0x10f   :  { %vm403_vm4 = vcmp.ge.f32.partialorder %v352_v23, 0.0  ;;  %v435_v27 = vmul.f32 0.2, %v352_v23  ;;  %v466_v31 = vsel %vm402_vm1, %v350_v18, %v434_v22  ;;  %v356_v35 = vadd.f32 %v355_v25, %v72_v28 }
 0x110   :  { %v357_v29 = vpop.f32.mrf.mxu0  ;;  %v488_v41 = vpack.c.bf16 %v466_v31, %v464_v39 }
 0x111   :  { %v358_v32 = vadd.f32 %v357_v29, %v73_v26  ;;  %v467_v34 = vsel %vm403_vm4, %v352_v23, %v435_v27  ;;  %v436_v46 = vmul.f32 0.2, %v356_v35  ;;  %vm404_vm7 = vcmp.ge.f32.partialorder %v356_v35, 0.0 }
 0x112   :  { %v359_v36 = vpop.f32.mrf.mxu0  ;;  %v489_v38 = vpack.c.bf16 %v467_v34, %v465_v33 }
 0x113   :  { %v360_v40 = vadd.f32 %v359_v36, %v74_v30  ;;  %v437_v43 = vmul.f32 0.2, %v358_v32  ;;  %vm405_vm6 = vcmp.ge.f32.partialorder %v358_v32, 0.0  ;;  %v468_v61 = vsel %vm404_vm7, %v356_v35, %v436_v46 }
 0x114   :  { %v361_v42 = vpop.f32.mrf.mxu0  ;;  %688 = vmatprep.mubr.bf16.mxu1 %v489_v38 }
 0x115   :  { %vm406_vm5 = vcmp.ge.f32.partialorder %v360_v40, 0.0  ;;  %v438_v44 = vmul.f32 0.2, %v360_v40  ;;  %v362_v45 = vadd.f32 %v361_v42, %v75_v37  ;;  %689 = vmatmul.mubr.bf16.gmra.mxu1 %v488_v41  ;;  %v469_v55 = vsel %vm405_vm6, %v358_v32, %v437_v43 }
 0x116   :  { %v365_v47 = vpop.f32.mrf.mxu0 }
 0x117   :  { %vm407_vm8 = vcmp.ge.f32.partialorder %v362_v45, 0.0  ;;  %v439_v49 = vmul.f32 0.2, %v362_v45  ;;  %v470_v53 = vsel %vm406_vm5, %v360_v40, %v438_v44  ;;  %v366_v57 = vadd.f32 %v365_v47, %v76_v50 }
 0x118   :  { %v367_v51 = vpop.f32.mrf.mxu0  ;;  %v490_v63 = vpack.c.bf16 %v470_v53, %v468_v61 }
 0x119   :  { %v368_v54 = vadd.f32 %v367_v51, %v77_v48  ;;  %v471_v56 = vsel %vm407_vm8, %v362_v45, %v439_v49  ;;  %v440_v4 = vmul.f32 0.2, %v366_v57  ;;  %vm408_vm11 = vcmp.ge.f32.partialorder %v366_v57, 0.0 }
 0x11a   :  { %v369_v58 = vpop.f32.mrf.mxu0  ;;  %v491_v60 = vpack.c.bf16 %v471_v56, %v469_v55 }
 0x11b   :  { %v370_v62 = vadd.f32 %v369_v58, %v78_v52  ;;  %v441_v1 = vmul.f32 0.2, %v368_v54  ;;  %vm409_vm10 = vcmp.ge.f32.partialorder %v368_v54, 0.0  ;;  %v472_v19 = vsel %vm408_vm11, %v366_v57, %v440_v4 }
 0x11c   :  { %v371_v0 = vpop.f32.mrf.mxu0  ;;  %696 = vmatprep.mubr.bf16.mxu1 %v491_v60 }
 0x11d   :  { %vm410_vm9 = vcmp.ge.f32.partialorder %v370_v62, 0.0  ;;  %v442_v2 = vmul.f32 0.2, %v370_v62  ;;  %v372_v3 = vadd.f32 %v371_v0, %v79_v59  ;;  %697 = vmatmul.mubr.bf16.gmra.mxu1 %v490_v63  ;;  %v473_v13 = vsel %vm409_vm10, %v368_v54, %v441_v1 }
 0x11e   :  { %v375_v5 = vpop.f32.mrf.mxu0 }
 0x11f   :  { %vm411_vm12 = vcmp.ge.f32.partialorder %v372_v3, 0.0  ;;  %v443_v7 = vmul.f32 0.2, %v372_v3  ;;  %v474_v11 = vsel %vm410_vm9, %v370_v62, %v442_v2  ;;  %v376_v15 = vadd.f32 %v375_v5, %v80_v8 }
 0x120   :  { %v377_v9 = vpop.f32.mrf.mxu0  ;;  %v492_v21 = vpack.c.bf16 %v474_v11, %v472_v19 }
 0x121   :  { %v378_v12 = vadd.f32 %v377_v9, %v81_v6  ;;  %v475_v14 = vsel %vm411_vm12, %v372_v3, %v443_v7  ;;  %v444_v26 = vmul.f32 0.2, %v376_v15  ;;  %vm412_vm15 = vcmp.ge.f32.partialorder %v376_v15, 0.0 }
 0x122   :  { %v379_v16 = vpop.f32.mrf.mxu0  ;;  %v493_v18 = vpack.c.bf16 %v475_v14, %v473_v13 }
 0x123   :  { %v380_v20 = vadd.f32 %v379_v16, %v82_v10  ;;  %v445_v23 = vmul.f32 0.2, %v378_v12  ;;  %vm413_vm14 = vcmp.ge.f32.partialorder %v378_v12, 0.0  ;;  %v476_v32 = vsel %vm412_vm15, %v376_v15, %v444_v26 }
 0x124   :  { %v381_v22 = vpop.f32.mrf.mxu0  ;;  %704 = vmatprep.mubr.bf16.mxu1 %v493_v18 }
 0x125   :  { %vm414_vm13 = vcmp.ge.f32.partialorder %v380_v20, 0.0  ;;  %v446_v24 = vmul.f32 0.2, %v380_v20  ;;  %v382_v25 = vadd.f32 %v381_v22, %v83_v17  ;;  %705 = vmatmul.mubr.bf16.gmra.mxu1 %v492_v21  ;;  %v477_v29 = vsel %vm413_vm14, %v378_v12, %v445_v23 }
 0x127   :  { %vm415_vm0 = vcmp.ge.f32.partialorder %v382_v25, 0.0  ;;  %v447_v27 = vmul.f32 0.2, %v382_v25  ;;  %v478_v28 = vsel %vm414_vm13, %v380_v20, %v446_v24 }
 0x128   :  { %v494_v33 = vpack.c.bf16 %v478_v28, %v476_v32 }
 0x129   :  { %v479_v30 = vsel %vm415_vm0, %v382_v25, %v447_v27 }
 0x12a   :  { %v495_v31 = vpack.c.bf16 %v479_v30, %v477_v29 }
 0x12c   :  { %712 = vmatprep.mubr.bf16.mxu1 %v495_v31 }
 0x12d   :  { %713 = vmatmul.mubr.bf16.gmra.mxu1 %v494_v33 }
 0x1b5   :  { %v864_v34 = vpop.f32.mrf.mxu1 }
 0x1b7   :  { %v865_v35 = vpop.f32.mrf.mxu1 }
 0x1b8   :  { %v866_v36 = vadd.f32 %v865_v35, %v864_v34 }
 0x1b9   :  { %v867_v37 = vpop.f32.mrf.mxu1 }
 0x1ba   :  { %vm721_vm1 = vcmp.ge.f32.partialorder %v866_v36, 0.0  ;;  %v737_v38 = vmul.f32 0.2, %v866_v36 }
 0x1bb   :  { %v868_v39 = vpop.f32.mrf.mxu1 }
 0x1bc   :  { %v753_v40 = vsel %vm721_vm1, %v866_v36, %v737_v38  ;;  %v869_v41 = vadd.f32 %v868_v39, %v867_v37 }
 0x1bd   :  { %770 = vst.msk [vmem:[%s1326_s4] sm:$0xff] %vm769_vm2, %v753_v40  ;;  %v870_v42 = vpop.f32.mrf.mxu1 }
 0x1be   :  { %vm722_vm3 = vcmp.ge.f32.partialorder %v869_v41, 0.0  ;;  %v738_v43 = vmul.f32 0.2, %v869_v41 }
 0x1bf   :  { %v871_v44 = vpop.f32.mrf.mxu1 }
 0x1c0   :  { %v754_v45 = vsel %vm722_vm3, %v869_v41, %v738_v43  ;;  %v872_v46 = vadd.f32 %v871_v44, %v870_v42 }
 0x1c1   :  { %771 = vst.msk [vmem:[%s1326_s4 + $0x8] sm:$0xff] %vm769_vm2, %v754_v45  ;;  %v873_v47 = vpop.f32.mrf.mxu1 }
 0x1c2   :  { %vm723_vm4 = vcmp.ge.f32.partialorder %v872_v46, 0.0  ;;  %v739_v48 = vmul.f32 0.2, %v872_v46 }
 0x1c3   :  { %v874_v49 = vpop.f32.mrf.mxu1 }
 0x1c4   :  { %v755_v50 = vsel %vm723_vm4, %v872_v46, %v739_v48  ;;  %v875_v51 = vadd.f32 %v874_v49, %v873_v47 }
 0x1c5   :  { %772 = vst.msk [vmem:[%s1326_s4 + $0x10] sm:$0xff] %vm769_vm2, %v755_v50  ;;  %v876_v52 = vpop.f32.mrf.mxu1 }
 0x1c6   :  { %vm724_vm5 = vcmp.ge.f32.partialorder %v875_v51, 0.0  ;;  %v740_v53 = vmul.f32 0.2, %v875_v51 }
 0x1c7   :  { %v877_v54 = vpop.f32.mrf.mxu1 }
 0x1c8   :  { %v756_v55 = vsel %vm724_vm5, %v875_v51, %v740_v53  ;;  %v878_v56 = vadd.f32 %v877_v54, %v876_v52 }
 0x1c9   :  { %773 = vst.msk [vmem:[%s1326_s4 + $0x18] sm:$0xff] %vm769_vm2, %v756_v55  ;;  %v879_v57 = vpop.f32.mrf.mxu1 }
 0x1ca   :  { %vm725_vm6 = vcmp.ge.f32.partialorder %v878_v56, 0.0  ;;  %v741_v58 = vmul.f32 0.2, %v878_v56 }
 0x1cb   :  { %v880_v59 = vpop.f32.mrf.mxu1 }
 0x1cc   :  { %v757_v60 = vsel %vm725_vm6, %v878_v56, %v741_v58  ;;  %v881_v61 = vadd.f32 %v880_v59, %v879_v57 }
 0x1cd   :  { %774 = vst.msk [vmem:[%s1326_s4 + $0x20] sm:$0xff] %vm769_vm2, %v757_v60  ;;  %v882_v62 = vpop.f32.mrf.mxu1 }
 0x1ce   :  { %vm726_vm7 = vcmp.ge.f32.partialorder %v881_v61, 0.0  ;;  %v742_v63 = vmul.f32 0.2, %v881_v61 }
 0x1cf   :  { %v883_v0 = vpop.f32.mrf.mxu1 }
 0x1d0   :  { %v758_v1 = vsel %vm726_vm7, %v881_v61, %v742_v63  ;;  %v884_v2 = vadd.f32 %v883_v0, %v882_v62 }
 0x1d1   :  { %775 = vst.msk [vmem:[%s1326_s4 + $0x28] sm:$0xff] %vm769_vm2, %v758_v1  ;;  %v885_v3 = vpop.f32.mrf.mxu1 }
 0x1d2   :  { %vm727_vm8 = vcmp.ge.f32.partialorder %v884_v2, 0.0  ;;  %v743_v4 = vmul.f32 0.2, %v884_v2 }
 0x1d3   :  { %v886_v5 = vpop.f32.mrf.mxu1 }
 0x1d4   :  { %v759_v6 = vsel %vm727_vm8, %v884_v2, %v743_v4  ;;  %v887_v7 = vadd.f32 %v886_v5, %v885_v3 }
 0x1d5   :  { %776 = vst.msk [vmem:[%s1326_s4 + $0x30] sm:$0xff] %vm769_vm2, %v759_v6  ;;  %v888_v8 = vpop.f32.mrf.mxu1 }
 0x1d6   :  { %vm728_vm9 = vcmp.ge.f32.partialorder %v887_v7, 0.0  ;;  %v744_v9 = vmul.f32 0.2, %v887_v7 }
 0x1d7   :  { %v889_v10 = vpop.f32.mrf.mxu1 }
 0x1d8   :  { %v760_v11 = vsel %vm728_vm9, %v887_v7, %v744_v9  ;;  %v890_v12 = vadd.f32 %v889_v10, %v888_v8 }
 0x1d9   :  { %777 = vst.msk [vmem:[%s1326_s4 + $0x38] sm:$0xff] %vm769_vm2, %v760_v11  ;;  %v891_v13 = vpop.f32.mrf.mxu1 }
 0x1da   :  { %vm729_vm10 = vcmp.ge.f32.partialorder %v890_v12, 0.0  ;;  %v745_v14 = vmul.f32 0.2, %v890_v12 }
 0x1db   :  { %v892_v15 = vpop.f32.mrf.mxu1 }
 0x1dc   :  { %v761_v16 = vsel %vm729_vm10, %v890_v12, %v745_v14  ;;  %v893_v17 = vadd.f32 %v892_v15, %v891_v13 }
 0x1dd   :  { %778 = vst.msk [vmem:[%s1326_s4 + $0x40] sm:$0xff] %vm769_vm2, %v761_v16  ;;  %v894_v18 = vpop.f32.mrf.mxu1 }
 0x1de   :  { %vm730_vm11 = vcmp.ge.f32.partialorder %v893_v17, 0.0  ;;  %v746_v19 = vmul.f32 0.2, %v893_v17 }
 0x1df   :  { %v895_v20 = vpop.f32.mrf.mxu1 }
 0x1e0   :  { %v762_v21 = vsel %vm730_vm11, %v893_v17, %v746_v19  ;;  %v896_v22 = vadd.f32 %v895_v20, %v894_v18 }
 0x1e1   :  { %779 = vst.msk [vmem:[%s1326_s4 + $0x48] sm:$0xff] %vm769_vm2, %v762_v21  ;;  %v897_v23 = vpop.f32.mrf.mxu1 }
 0x1e2   :  { %vm731_vm12 = vcmp.ge.f32.partialorder %v896_v22, 0.0  ;;  %v747_v24 = vmul.f32 0.2, %v896_v22 }
 0x1e3   :  { %v898_v25 = vpop.f32.mrf.mxu1 }
 0x1e4   :  { %v763_v26 = vsel %vm731_vm12, %v896_v22, %v747_v24  ;;  %v899_v27 = vadd.f32 %v898_v25, %v897_v23 }
 0x1e5   :  { %780 = vst.msk [vmem:[%s1326_s4 + $0x50] sm:$0xff] %vm769_vm2, %v763_v26  ;;  %v900_v28 = vpop.f32.mrf.mxu1 }
 0x1e6   :  { %vm732_vm13 = vcmp.ge.f32.partialorder %v899_v27, 0.0  ;;  %v748_v29 = vmul.f32 0.2, %v899_v27 }
 0x1e7   :  { %v901_v30 = vpop.f32.mrf.mxu1 }
 0x1e8   :  { %v764_v31 = vsel %vm732_vm13, %v899_v27, %v748_v29  ;;  %v902_v32 = vadd.f32 %v901_v30, %v900_v28 }
 0x1e9   :  { %781 = vst.msk [vmem:[%s1326_s4 + $0x58] sm:$0xff] %vm769_vm2, %v764_v31  ;;  %v903_v33 = vpop.f32.mrf.mxu1 }
 0x1ea   :  { %vm733_vm14 = vcmp.ge.f32.partialorder %v902_v32, 0.0  ;;  %v749_v34 = vmul.f32 0.2, %v902_v32 }
 0x1eb   :  { %v904_v35 = vpop.f32.mrf.mxu1 }
 0x1ec   :  { %v765_v36 = vsel %vm733_vm14, %v902_v32, %v749_v34  ;;  %v905_v37 = vadd.f32 %v904_v35, %v903_v33 }
 0x1ed   :  { %782 = vst.msk [vmem:[%s1326_s4 + $0x60] sm:$0xff] %vm769_vm2, %v765_v36  ;;  %v906_v38 = vpop.f32.mrf.mxu1 }
 0x1ee   :  { %vm734_vm15 = vcmp.ge.f32.partialorder %v905_v37, 0.0  ;;  %v750_v39 = vmul.f32 0.2, %v905_v37 }
 0x1ef   :  { %v907_v40 = vpop.f32.mrf.mxu1 }
 0x1f0   :  { %v766_v41 = vsel %vm734_vm15, %v905_v37, %v750_v39  ;;  %v908_v42 = vadd.f32 %v907_v40, %v906_v38 }
 0x1f1   :  { %783 = vst.msk [vmem:[%s1326_s4 + $0x68] sm:$0xff] %vm769_vm2, %v766_v41  ;;  %v909_v43 = vpop.f32.mrf.mxu1 }
 0x1f2   :  { %vm735_vm0 = vcmp.ge.f32.partialorder %v908_v42, 0.0  ;;  %v751_v44 = vmul.f32 0.2, %v908_v42 }
 0x1f3   :  { %v910_v45 = vpop.f32.mrf.mxu1 }
 0x1f4   :  { %v767_v46 = vsel %vm735_vm0, %v908_v42, %v751_v44  ;;  %v911_v47 = vadd.f32 %v910_v45, %v909_v43 }
 0x1f5   :  { %784 = vst.msk [vmem:[%s1326_s4 + $0x70] sm:$0xff] %vm769_vm2, %v767_v46 }
 0x1f6   :  { %vm736_vm1 = vcmp.ge.f32.partialorder %v911_v47, 0.0  ;;  %v752_v48 = vmul.f32 0.2, %v911_v47 }
 0x1f8   :  { %v768_v49 = vsel %vm736_vm1, %v911_v47, %v752_v48 }
 0x1f9   :  { %785 = vst.msk [vmem:[%s1326_s4 + $0x78] sm:$0xff] %vm769_vm2, %v768_v49 }

// kernel: discriminator_forward.3
= control target key start
LH: loop header
LB: loop body
LE: loop exit
PB: predicated region body
PF: predicated region fallthrough
CT: control target
= control target key end

     0   :  { %vm1432_vm1 = vcmask 1043456   ;;  %vm1439_vm2 = vcmask 3072   ;;  %s2337_s1 = inlined_call_operand.vmem [shape: bf16[2048,128], index: 1, kind: input, shape index: {}]   ;;  %s2338_s0 = inlined_call_operand.vmem [shape: f32[4,2048], index: 0, kind: input, shape index: {}]   ;;  %s2339_s2 = inlined_call_operand.vmem [shape: f32[1,128], index: 2, kind: input, shape index: {}]   ;;  %s2340_s3 = inlined_call_operand.vmem [shape: f32[1,128], index: 3, kind: input, shape index: {}]   ;;  %s2341_s4 = inlined_call_operand.<no memory space> [shape: f32[1], index: 4, kind: input, shape index: {}]   ;;  %s2342_s5 = inlined_call_operand.vmem [shape: f32[4,1], index: 5, kind: output, shape index: {}]  }
   0x1   :  { %v1751_v0 = vld [vmem:[%s2337_s1 + $0x78] sm:$0xff]   ;;  %v1755_v4 = vld [vmem:[%s2337_s1 + $0x70] sm:$0xff]   ;;  %v1759_v8 = vld [vmem:[%s2337_s1 + $0x68] sm:$0xff]  }
   0x2   :  { %v1752_v1 = vld [vmem:[%s2337_s1 + $0xf8] sm:$0xff]   ;;  %1575 = vmatprep.subr.bf16.mxu0 %v1751_v0  ;;  %v1756_v5 = vld [vmem:[%s2337_s1 + $0xf0] sm:$0xff]   ;;  %v1760_v9 = vld [vmem:[%s2337_s1 + $0xe8] sm:$0xff]  }
   0x3   :  { %v1753_v2 = vld [vmem:[%s2337_s1 + $0x38] sm:$0xff]   ;;  %1597 = vmatprep.subr.bf16.mxu1 %v1752_v1  ;;  %v1757_v6 = vld [vmem:[%s2337_s1 + $0x30] sm:$0xff]   ;;  %v1761_v10 = vld [vmem:[%s2337_s1 + $0x28] sm:$0xff]  }
   0x4   :  { %v1754_v3 = vld [vmem:[%s2337_s1 + $0xb8] sm:$0xff]   ;;  %1576 = vmatpush3.bf16.msra.mxu0 %v1753_v2  ;;  %v1758_v7 = vld [vmem:[%s2337_s1 + $0xb0] sm:$0xff]   ;;  %v1762_v11 = vld [vmem:[%s2337_s1 + $0xa8] sm:$0xff]  }
   0x5   :  { %1598 = vmatpush3.bf16.msra.mxu1 %v1754_v3  ;;  %1577 = vmatprep.subr.bf16.mxu0 %v1755_v4  ;;  %v1763_v12 = vld [vmem:[%s2337_s1 + $0x60] sm:$0xff]   ;;  %v1767_v16 = vld [vmem:[%s2337_s1 + $0x58] sm:$0xff]   ;;  %v1771_v20 = vld [vmem:[%s2337_s1 + $0x50] sm:$0xff]  }
   0x6   :  { %1599 = vmatprep.subr.bf16.mxu1 %v1756_v5  ;;  %v1764_v13 = vld [vmem:[%s2337_s1 + $0xe0] sm:$0xff]   ;;  %v1768_v17 = vld [vmem:[%s2337_s1 + $0xd8] sm:$0xff]   ;;  %v1772_v21 = vld [vmem:[%s2337_s1 + $0xd0] sm:$0xff]  }
   0x7   :  { %v1765_v14 = vld [vmem:[%s2337_s1 + $0x20] sm:$0xff]   ;;  %v1769_v18 = vld [vmem:[%s2337_s1 + $0x18] sm:$0xff]   ;;  %v1773_v22 = vld [vmem:[%s2337_s1 + $0x10] sm:$0xff]  }
   0x8   :  { %1578 = vmatpush3.bf16.msra.mxu0 %v1757_v6  ;;  %v1766_v15 = vld [vmem:[%s2337_s1 + $0xa0] sm:$0xff]   ;;  %v1770_v19 = vld [vmem:[%s2337_s1 + $0x98] sm:$0xff]   ;;  %v1774_v23 = vld [vmem:[%s2337_s1 + $0x90] sm:$0xff]  }
   0x9   :  { %1600 = vmatpush3.bf16.msra.mxu1 %v1758_v7  ;;  %1579 = vmatprep.subr.bf16.mxu0 %v1759_v8  ;;  %v1775_v24 = vld [vmem:[%s2337_s1 + $0x48] sm:$0xff]   ;;  %v1779_v28 = vld [vmem:[%s2337_s1 + $0x40] sm:$0xff]   ;;  %v1785_v36 = vld [vmem:[%s2337_s1 + $0x178] sm:$0xff]  }
   0xa   :  { %1601 = vmatprep.subr.bf16.mxu1 %v1760_v9  ;;  %v1776_v25 = vld [vmem:[%s2337_s1 + $0xc8] sm:$0xff]   ;;  %v1780_v29 = vld [vmem:[%s2337_s1 + $0xc0] sm:$0xff]   ;;  %v1786_v39 = vld [vmem:[%s2337_s1 + $0x1f8] sm:$0xff]  }
   0xb   :  { %v1777_v26 = vld [vmem:[%s2337_s1 + $0x8] sm:$0xff]   ;;  %v1781_v30 = vld [vmem:[%s2337_s1] sm:$0xff]   ;;  %v1787_v42 = vld [vmem:[%s2337_s1 + $0x138] sm:$0xff]  }
   0xc   :  { %1580 = vmatpush3.bf16.msra.mxu0 %v1761_v10  ;;  %v1778_v27 = vld [vmem:[%s2337_s1 + $0x88] sm:$0xff]   ;;  %v1782_v31 = vld [vmem:[%s2337_s1 + $0x80] sm:$0xff]   ;;  %v1788_v43 = vld [vmem:[%s2337_s1 + $0x1b8] sm:$0xff]  }
   0xd   :  { %1602 = vmatpush3.bf16.msra.mxu1 %v1762_v11  ;;  %1581 = vmatprep.subr.bf16.mxu0 %v1763_v12  ;;  %v22_v32 = vld [vmem:[%s2338_s0] sm:$0xff]  ;;  %v23_v33 = vld [vmem:[%s2338_s0 + $0x8] sm:$0xff]  ;;  %v1789_v44 = vld [vmem:[%s2337_s1 + $0x170] sm:$0xff]  }
   0xe   :  { %1603 = vmatprep.subr.bf16.mxu1 %v1764_v13  ;;  %v38_v34 = vcombine.high %v22_v32, %v22_v32  ;;  %v39_v35 = vcombine.high %v23_v33, %v23_v33  ;;  %v54_v37 = vpack.c.bf16 %v22_v32, %v22_v32  ;;  %v56_v38 = vpack.c.bf16 %v23_v33, %v23_v33  ;;  %v1790_v45 = vld [vmem:[%s2337_s1 + $0x1f0] sm:$0xff]   ;;  %v1793_v48 = vld [vmem:[%s2337_s1 + $0x168] sm:$0xff]   ;;  %v1797_v52 = vld [vmem:[%s2337_s1 + $0x160] sm:$0xff]  }
   0xf   :  { %v1791_v46 = vld [vmem:[%s2337_s1 + $0x130] sm:$0xff]   ;;  %v1794_v49 = vld [vmem:[%s2337_s1 + $0x1e8] sm:$0xff]   ;;  %v1798_v53 = vld [vmem:[%s2337_s1 + $0x1e0] sm:$0xff]  }
  0x10   :  { %1582 = vmatpush3.bf16.msra.mxu0 %v1765_v14  ;;  %v55_v40 = vpack.c.bf16 %v38_v34, %v38_v34  ;;  %v57_v41 = vpack.c.bf16 %v39_v35, %v39_v35  ;;  %v1792_v47 = vld [vmem:[%s2337_s1 + $0x1b0] sm:$0xff]   ;;  %v1795_v50 = vld [vmem:[%s2337_s1 + $0x128] sm:$0xff]   ;;  %v1799_v54 = vld [vmem:[%s2337_s1 + $0x120] sm:$0xff]  }
  0x11   :  { %1604 = vmatpush3.bf16.msra.mxu1 %v1766_v15  ;;  %1583 = vmatprep.subr.bf16.mxu0 %v1767_v16  ;;  %v1796_v51 = vld [vmem:[%s2337_s1 + $0x1a8] sm:$0xff]   ;;  %v1800_v55 = vld [vmem:[%s2337_s1 + $0x1a0] sm:$0xff]   ;;  %v1801_v56 = vld [vmem:[%s2337_s1 + $0x158] sm:$0xff]  }
  0x12   :  { %1605 = vmatprep.subr.bf16.mxu1 %v1768_v17  ;;  %1133 = vmatprep.mubr.bf16.mxu0 %v55_v40  ;;  %v1802_v57 = vld [vmem:[%s2337_s1 + $0x1d8] sm:$0xff]   ;;  %v1805_v60 = vld [vmem:[%s2337_s1 + $0x150] sm:$0xff]   ;;  %v1809_v0 = vld [vmem:[%s2337_s1 + $0x148] sm:$0xff]  }
  0x13   :  { %1173 = vmatprep.mubr.bf16.mxu1 %v57_v41  ;;  %v1803_v58 = vld [vmem:[%s2337_s1 + $0x118] sm:$0xff]   ;;  %v1806_v61 = vld [vmem:[%s2337_s1 + $0x1d0] sm:$0xff]   ;;  %v1810_v1 = vld [vmem:[%s2337_s1 + $0x1c8] sm:$0xff]  }
  0x14   :  { %1584 = vmatpush3.bf16.msra.mxu0 %v1769_v18  ;;  %v1804_v59 = vld [vmem:[%s2337_s1 + $0x198] sm:$0xff]   ;;  %v1807_v62 = vld [vmem:[%s2337_s1 + $0x110] sm:$0xff]   ;;  %v1811_v2 = vld [vmem:[%s2337_s1 + $0x108] sm:$0xff]  }
  0x15   :  { %1606 = vmatpush3.bf16.msra.mxu1 %v1770_v19  ;;  %1585 = vmatprep.subr.bf16.mxu0 %v1771_v20  ;;  %v1808_v63 = vld [vmem:[%s2337_s1 + $0x190] sm:$0xff]   ;;  %v1812_v3 = vld [vmem:[%s2337_s1 + $0x188] sm:$0xff]   ;;  %v1813_v4 = vld [vmem:[%s2337_s1 + $0x140] sm:$0xff]  }
  0x16   :  { %1607 = vmatprep.subr.bf16.mxu1 %v1772_v21  ;;  %v1814_v5 = vld [vmem:[%s2337_s1 + $0x1c0] sm:$0xff]   ;;  %v24_v8 = vld [vmem:[%s2338_s0 + $0x10] sm:$0xff]  ;;  %v25_v10 = vld [vmem:[%s2338_s0 + $0x18] sm:$0xff] }
  0x17   :  { %v1815_v6 = vld [vmem:[%s2337_s1 + $0x100] sm:$0xff]   ;;  %v40_v9 = vcombine.high %v24_v8, %v24_v8  ;;  %v58_v11 = vpack.c.bf16 %v24_v8, %v24_v8  ;;  %v41_v12 = vcombine.high %v25_v10, %v25_v10  ;;  %v1819_v13 = vld [vmem:[%s2337_s1 + $0x278] sm:$0xff]   ;;  %v60_v15 = vpack.c.bf16 %v25_v10, %v25_v10  ;;  %v1823_v20 = vld [vmem:[%s2337_s1 + $0x270] sm:$0xff]  }
  0x18   :  { %1586 = vmatpush3.bf16.msra.mxu0 %v1773_v22  ;;  %v1816_v7 = vld [vmem:[%s2337_s1 + $0x180] sm:$0xff]   ;;  %v1820_v16 = vld [vmem:[%s2337_s1 + $0x2f8] sm:$0xff]   ;;  %v1824_v21 = vld [vmem:[%s2337_s1 + $0x2f0] sm:$0xff]  }
  0x19   :  { %1608 = vmatpush3.bf16.msra.mxu1 %v1774_v23  ;;  %1587 = vmatprep.subr.bf16.mxu0 %v1775_v24  ;;  %v59_v14 = vpack.c.bf16 %v40_v9, %v40_v9  ;;  %v61_v17 = vpack.c.bf16 %v41_v12, %v41_v12  ;;  %v1821_v18 = vld [vmem:[%s2337_s1 + $0x238] sm:$0xff]   ;;  %v1825_v22 = vld [vmem:[%s2337_s1 + $0x230] sm:$0xff]   ;;  %v1827_v24 = vld [vmem:[%s2337_s1 + $0x268] sm:$0xff]  }
  0x1a   :  { %1609 = vmatprep.subr.bf16.mxu1 %v1776_v25  ;;  %v1822_v19 = vld [vmem:[%s2337_s1 + $0x2b8] sm:$0xff]   ;;  %v1826_v23 = vld [vmem:[%s2337_s1 + $0x2b0] sm:$0xff]   ;;  %v1828_v25 = vld [vmem:[%s2337_s1 + $0x2e8] sm:$0xff]  }
  0x1b   :  { %v1835_v32 = vld [vmem:[%s2337_s1 + $0x258] sm:$0xff]   ;;  %v1843_v40 = vld [vmem:[%s2337_s1 + $0x248] sm:$0xff]   ;;  %v1873_v12 = vld [vmem:[%s2337_s1 + $0x350] sm:$0xff]  }
  0x1c   :  { %1588 = vmatpush3.bf16.msra.mxu0 %v1777_v26  ;;  %v1829_v26 = vld [vmem:[%s2337_s1 + $0x228] sm:$0xff]   ;;  %v1836_v33 = vld [vmem:[%s2337_s1 + $0x2d8] sm:$0xff]  }
  0x1d   :  { %1610 = vmatpush3.bf16.msra.mxu1 %v1778_v27  ;;  %1589 = vmatprep.subr.bf16.mxu0 %v1779_v28  ;;  %v1830_v27 = vld [vmem:[%s2337_s1 + $0x2a8] sm:$0xff]   ;;  %v1831_v28 = vld [vmem:[%s2337_s1 + $0x260] sm:$0xff]   ;;  %v1837_v34 = vld [vmem:[%s2337_s1 + $0x218] sm:$0xff]  }
  0x1e   :  { %1611 = vmatprep.subr.bf16.mxu1 %v1780_v29  ;;  %v1832_v29 = vld [vmem:[%s2337_s1 + $0x2e0] sm:$0xff]   ;;  %v1838_v35 = vld [vmem:[%s2337_s1 + $0x298] sm:$0xff]   ;;  %v1844_v41 = vld [vmem:[%s2337_s1 + $0x2c8] sm:$0xff]  }
  0x1f   :  { %v1869_v8 = vld [vmem:[%s2337_s1 + $0x358] sm:$0xff]  }
  0x20   :  { %1590 = vmatpush3.bf16.msra.mxu0 %v1781_v30  ;;  %v1833_v30 = vld [vmem:[%s2337_s1 + $0x220] sm:$0xff]   ;;  %v1870_v9 = vld [vmem:[%s2337_s1 + $0x3d8] sm:$0xff]  }
  0x21   :  { %1612 = vmatpush3.bf16.msra.mxu1 %v1782_v31  ;;  %1619 = vmatprep.subr.bf16.mxu0 %v1785_v36  ;;  %v1834_v31 = vld [vmem:[%s2337_s1 + $0x2a0] sm:$0xff]   ;;  %v1839_v36 = vld [vmem:[%s2337_s1 + $0x250] sm:$0xff]   ;;  %v1871_v10 = vld [vmem:[%s2337_s1 + $0x318] sm:$0xff]  }
  0x22   :  { %1641 = vmatprep.subr.bf16.mxu1 %v1786_v39  ;;  %v1842_v39 = vld [vmem:[%s2337_s1 + $0x290] sm:$0xff]  }
  0x23   :  { %1134 = vmatmul.mubr.bf16.vlgmr.msra.gmra.mxu0 %v54_v37  ;;  %v1840_v37 = vld [vmem:[%s2337_s1 + $0x2d0] sm:$0xff]  }
  0x24   :  { %1174 = vmatmul.mubr.bf16.vlgmr.msra.gmra.mxu1 %v56_v38  ;;  %1620 = vmatpush3.bf16.msra.mxu0 %v1787_v42  ;;  %v1841_v38 = vld [vmem:[%s2337_s1 + $0x210] sm:$0xff]   ;;  %v1845_v42 = vld [vmem:[%s2337_s1 + $0x208] sm:$0xff]  }
  0x25   :  { %1642 = vmatpush3.bf16.msra.mxu1 %v1788_v43  ;;  %1621 = vmatprep.subr.bf16.mxu0 %v1789_v44  ;;  %v1846_v43 = vld [vmem:[%s2337_s1 + $0x288] sm:$0xff]   ;;  %v1847_v44 = vld [vmem:[%s2337_s1 + $0x240] sm:$0xff]  }
  0x26   :  { %1643 = vmatprep.subr.bf16.mxu1 %v1790_v45  ;;  %1213 = vmatprep.mubr.bf16.mxu0 %v59_v14  ;;  %v1848_v45 = vld [vmem:[%s2337_s1 + $0x2c0] sm:$0xff]   ;;  %v1875_v14 = vld [vmem:[%s2337_s1 + $0x310] sm:$0xff]  }
  0x27   :  { %1253 = vmatprep.mubr.bf16.mxu1 %v61_v17  ;;  %v1878_v17 = vld [vmem:[%s2337_s1 + $0x3c8] sm:$0xff]  }
  0x28   :  { %1622 = vmatpush3.bf16.msra.mxu0 %v1791_v46  ;;  %v1849_v46 = vld [vmem:[%s2337_s1 + $0x200] sm:$0xff]  }
  0x29   :  { %1644 = vmatpush3.bf16.msra.mxu1 %v1792_v47  ;;  %1623 = vmatprep.subr.bf16.mxu0 %v1793_v48  ;;  %v1850_v47 = vld [vmem:[%s2337_s1 + $0x280] sm:$0xff]  }
  0x2a   :  { %1645 = vmatprep.subr.bf16.mxu1 %v1794_v49  ;;  %v26_v48 = vld [vmem:[%s2338_s0 + $0x20] sm:$0xff]  ;;  %v27_v49 = vld [vmem:[%s2338_s0 + $0x28] sm:$0xff] }
  0x2c   :  { %1624 = vmatpush3.bf16.msra.mxu0 %v1795_v50  ;;  %v42_v50 = vcombine.high %v26_v48, %v26_v48 }
  0x2d   :  { %1646 = vmatpush3.bf16.msra.mxu1 %v1796_v51  ;;  %1625 = vmatprep.subr.bf16.mxu0 %v1797_v52  ;;  %v43_v51 = vcombine.high %v27_v49, %v27_v49  ;;  %v1853_v52 = vld [vmem:[%s2337_s1 + $0x378] sm:$0xff]  }
  0x2e   :  { %1647 = vmatprep.subr.bf16.mxu1 %v1798_v53  ;;  %v62_v53 = vpack.c.bf16 %v26_v48, %v26_v48 }
  0x30   :  { %1626 = vmatpush3.bf16.msra.mxu0 %v1799_v54  ;;  %v64_v54 = vpack.c.bf16 %v27_v49, %v27_v49 }
  0x31   :  { %1648 = vmatpush3.bf16.msra.mxu1 %v1800_v55  ;;  %1627 = vmatprep.subr.bf16.mxu0 %v1801_v56  ;;  %v1854_v55 = vld [vmem:[%s2337_s1 + $0x3f8] sm:$0xff]   ;;  %v63_v56 = vpack.c.bf16 %v42_v50, %v42_v50 }
  0x32   :  { %1649 = vmatprep.subr.bf16.mxu1 %v1802_v57  ;;  %v65_v57 = vpack.c.bf16 %v43_v51, %v43_v51 }
  0x34   :  { %1628 = vmatpush3.bf16.msra.mxu0 %v1803_v58  ;;  %v1855_v58 = vld [vmem:[%s2337_s1 + $0x338] sm:$0xff]  }
  0x35   :  { %1650 = vmatpush3.bf16.msra.mxu1 %v1804_v59  ;;  %1629 = vmatprep.subr.bf16.mxu0 %v1805_v60  ;;  %v1856_v59 = vld [vmem:[%s2337_s1 + $0x3b8] sm:$0xff]   ;;  %v1857_v60 = vld [vmem:[%s2337_s1 + $0x370] sm:$0xff]  }
  0x36   :  { %1651 = vmatprep.subr.bf16.mxu1 %v1806_v61  ;;  %v1858_v61 = vld [vmem:[%s2337_s1 + $0x3f0] sm:$0xff]  }
  0x38   :  { %1630 = vmatpush3.bf16.msra.mxu0 %v1807_v62  ;;  %v1859_v62 = vld [vmem:[%s2337_s1 + $0x330] sm:$0xff]  }
  0x39   :  { %1652 = vmatpush3.bf16.msra.mxu1 %v1808_v63  ;;  %1631 = vmatprep.subr.bf16.mxu0 %v1809_v0  ;;  %v1860_v63 = vld [vmem:[%s2337_s1 + $0x3b0] sm:$0xff]   ;;  %v1861_v0 = vld [vmem:[%s2337_s1 + $0x368] sm:$0xff]  }
  0x3a   :  { %1653 = vmatprep.subr.bf16.mxu1 %v1810_v1  ;;  %v1862_v1 = vld [vmem:[%s2337_s1 + $0x3e8] sm:$0xff]  }
  0x3c   :  { %1632 = vmatpush3.bf16.msra.mxu0 %v1811_v2  ;;  %v1863_v2 = vld [vmem:[%s2337_s1 + $0x328] sm:$0xff]  }
  0x3d   :  { %1654 = vmatpush3.bf16.msra.mxu1 %v1812_v3  ;;  %1633 = vmatprep.subr.bf16.mxu0 %v1813_v4  ;;  %v1864_v3 = vld [vmem:[%s2337_s1 + $0x3a8] sm:$0xff]   ;;  %v1865_v4 = vld [vmem:[%s2337_s1 + $0x360] sm:$0xff]  }
  0x3e   :  { %1655 = vmatprep.subr.bf16.mxu1 %v1814_v5  ;;  %v1866_v5 = vld [vmem:[%s2337_s1 + $0x3e0] sm:$0xff]  }
  0x40   :  { %1634 = vmatpush3.bf16.msra.mxu0 %v1815_v6  ;;  %v1867_v6 = vld [vmem:[%s2337_s1 + $0x320] sm:$0xff]  }
  0x41   :  { %1656 = vmatpush3.bf16.msra.mxu1 %v1816_v7  ;;  %1663 = vmatprep.subr.bf16.mxu0 %v1819_v13  ;;  %v1868_v7 = vld [vmem:[%s2337_s1 + $0x3a0] sm:$0xff]   ;;  %v1874_v13 = vld [vmem:[%s2337_s1 + $0x3d0] sm:$0xff]  }
  0x42   :  { %1685 = vmatprep.subr.bf16.mxu1 %v1820_v16  ;;  %v1877_v16 = vld [vmem:[%s2337_s1 + $0x348] sm:$0xff]  }
  0x43   :  { %1214 = vmatmul.mubr.bf16.vlgmr.msra.gmra.mxu0 %v58_v11  ;;  %v1872_v11 = vld [vmem:[%s2337_s1 + $0x398] sm:$0xff]  }
  0x44   :  { %1254 = vmatmul.mubr.bf16.vlgmr.msra.gmra.mxu1 %v60_v15  ;;  %1664 = vmatpush3.bf16.msra.mxu0 %v1821_v18  ;;  %v1876_v15 = vld [vmem:[%s2337_s1 + $0x390] sm:$0xff]   ;;  %v1879_v18 = vld [vmem:[%s2337_s1 + $0x308] sm:$0xff]  }
  0x45   :  { %1686 = vmatpush3.bf16.msra.mxu1 %v1822_v19  ;;  %1665 = vmatprep.subr.bf16.mxu0 %v1823_v20  ;;  %v1880_v19 = vld [vmem:[%s2337_s1 + $0x388] sm:$0xff]   ;;  %v1881_v20 = vld [vmem:[%s2337_s1 + $0x340] sm:$0xff]  }
  0x46   :  { %1687 = vmatprep.subr.bf16.mxu1 %v1824_v21  ;;  %1293 = vmatprep.mubr.bf16.mxu0 %v63_v56  ;;  %v1882_v21 = vld [vmem:[%s2337_s1 + $0x3c0] sm:$0xff]  }
  0x47   :  { %1333 = vmatprep.mubr.bf16.mxu1 %v65_v57 }
  0x48   :  { %1666 = vmatpush3.bf16.msra.mxu0 %v1825_v22  ;;  %v1883_v22 = vld [vmem:[%s2337_s1 + $0x300] sm:$0xff]  }
  0x49   :  { %1688 = vmatpush3.bf16.msra.mxu1 %v1826_v23  ;;  %1667 = vmatprep.subr.bf16.mxu0 %v1827_v24  ;;  %v1884_v23 = vld [vmem:[%s2337_s1 + $0x380] sm:$0xff]   ;;  %v28_v24 = vld [vmem:[%s2338_s0 + $0x30] sm:$0xff] }
  0x4a   :  { %1689 = vmatprep.subr.bf16.mxu1 %v1828_v25  ;;  %v29_v25 = vld [vmem:[%s2338_s0 + $0x38] sm:$0xff] }
  0x4c   :  { %1668 = vmatpush3.bf16.msra.mxu0 %v1829_v26  ;;  %v44_v26 = vcombine.high %v28_v24, %v28_v24 }
  0x4d   :  { %1690 = vmatpush3.bf16.msra.mxu1 %v1830_v27  ;;  %1669 = vmatprep.subr.bf16.mxu0 %v1831_v28  ;;  %v45_v27 = vcombine.high %v29_v25, %v29_v25  ;;  %v66_v28 = vpack.c.bf16 %v28_v24, %v28_v24 }
  0x4e   :  { %1691 = vmatprep.subr.bf16.mxu1 %v1832_v29  ;;  %v68_v29 = vpack.c.bf16 %v29_v25, %v29_v25 }
  0x50   :  { %1670 = vmatpush3.bf16.msra.mxu0 %v1833_v30  ;;  %v67_v30 = vpack.c.bf16 %v44_v26, %v44_v26 }
  0x51   :  { %1692 = vmatpush3.bf16.msra.mxu1 %v1834_v31  ;;  %1671 = vmatprep.subr.bf16.mxu0 %v1835_v32  ;;  %v69_v31 = vpack.c.bf16 %v45_v27, %v45_v27 }
  0x52   :  { %1693 = vmatprep.subr.bf16.mxu1 %v1836_v33 }
  0x54   :  { %1672 = vmatpush3.bf16.msra.mxu0 %v1837_v34  ;;  %v1445_v34 = vld [vmem:[%s2339_s2] ss:$0 sm:$0xff] }
  0x55   :  { %1694 = vmatpush3.bf16.msra.mxu1 %v1838_v35  ;;  %1673 = vmatprep.subr.bf16.mxu0 %v1839_v36 }
  0x56   :  { %1695 = vmatprep.subr.bf16.mxu1 %v1840_v37 }
  0x58   :  { %1674 = vmatpush3.bf16.msra.mxu0 %v1841_v38 }
  0x59   :  { %1696 = vmatpush3.bf16.msra.mxu1 %v1842_v39  ;;  %1675 = vmatprep.subr.bf16.mxu0 %v1843_v40 }
  0x5a   :  { %1697 = vmatprep.subr.bf16.mxu1 %v1844_v41 }
  0x5c   :  { %1676 = vmatpush3.bf16.msra.mxu0 %v1845_v42 }
  0x5d   :  { %1698 = vmatpush3.bf16.msra.mxu1 %v1846_v43  ;;  %1677 = vmatprep.subr.bf16.mxu0 %v1847_v44 }
  0x5e   :  { %1699 = vmatprep.subr.bf16.mxu1 %v1848_v45 }
  0x60   :  { %1678 = vmatpush3.bf16.msra.mxu0 %v1849_v46 }
  0x61   :  { %1700 = vmatpush3.bf16.msra.mxu1 %v1850_v47  ;;  %1707 = vmatprep.subr.bf16.mxu0 %v1853_v52 }
  0x62   :  { %1729 = vmatprep.subr.bf16.mxu1 %v1854_v55 }
  0x63   :  { %1294 = vmatmul.mubr.bf16.vlgmr.msra.gmra.mxu0 %v62_v53 }
  0x64   :  { %1334 = vmatmul.mubr.bf16.vlgmr.msra.gmra.mxu1 %v64_v54  ;;  %1708 = vmatpush3.bf16.msra.mxu0 %v1855_v58 }
  0x65   :  { %1730 = vmatpush3.bf16.msra.mxu1 %v1856_v59  ;;  %1709 = vmatprep.subr.bf16.mxu0 %v1857_v60 }
  0x66   :  { %1731 = vmatprep.subr.bf16.mxu1 %v1858_v61  ;;  %1373 = vmatprep.mubr.bf16.mxu0 %v67_v30 }
  0x67   :  { %1413 = vmatprep.mubr.bf16.mxu1 %v69_v31 }
  0x68   :  { %1710 = vmatpush3.bf16.msra.mxu0 %v1859_v62 }
  0x69   :  { %1732 = vmatpush3.bf16.msra.mxu1 %v1860_v63  ;;  %1711 = vmatprep.subr.bf16.mxu0 %v1861_v0 }
  0x6a   :  { %1733 = vmatprep.subr.bf16.mxu1 %v1862_v1 }
  0x6c   :  { %1712 = vmatpush3.bf16.msra.mxu0 %v1863_v2 }
  0x6d   :  { %1734 = vmatpush3.bf16.msra.mxu1 %v1864_v3  ;;  %1713 = vmatprep.subr.bf16.mxu0 %v1865_v4 }
  0x6e   :  { %1735 = vmatprep.subr.bf16.mxu1 %v1866_v5 }
  0x70   :  { %1714 = vmatpush3.bf16.msra.mxu0 %v1867_v6 }
  0x71   :  { %1736 = vmatpush3.bf16.msra.mxu1 %v1868_v7  ;;  %1715 = vmatprep.subr.bf16.mxu0 %v1869_v8 }
  0x72   :  { %1737 = vmatprep.subr.bf16.mxu1 %v1870_v9 }
  0x74   :  { %1716 = vmatpush3.bf16.msra.mxu0 %v1871_v10 }
  0x75   :  { %1738 = vmatpush3.bf16.msra.mxu1 %v1872_v11  ;;  %1717 = vmatprep.subr.bf16.mxu0 %v1873_v12 }
  0x76   :  { %1739 = vmatprep.subr.bf16.mxu1 %v1874_v13 }
  0x78   :  { %1718 = vmatpush3.bf16.msra.mxu0 %v1875_v14 }
  0x79   :  { %1740 = vmatpush3.bf16.msra.mxu1 %v1876_v15  ;;  %1719 = vmatprep.subr.bf16.mxu0 %v1877_v16 }
  0x7a   :  { %1741 = vmatprep.subr.bf16.mxu1 %v1878_v17 }
  0x7c   :  { %1720 = vmatpush3.bf16.msra.mxu0 %v1879_v18  ;;  %v1574_v18 = vld [vmem:[%s2340_s3] ss:$0 sm:$0xff] }
  0x7d   :  { %1742 = vmatpush3.bf16.msra.mxu1 %v1880_v19  ;;  %1721 = vmatprep.subr.bf16.mxu0 %v1881_v20 }
  0x7e   :  { %1743 = vmatprep.subr.bf16.mxu1 %v1882_v21 }
  0x80   :  { %1722 = vmatpush3.bf16.msra.mxu0 %v1883_v22  ;;  %v1437_v22 = vstv %s2341_s4 }
  0x81   :  { %1744 = vmatpush3.bf16.msra.mxu1 %v1884_v23 }
  0x83   :  { %1374 = vmatmul.mubr.bf16.vlgmr.msra.gmra.mxu0 %v66_v28 }
  0x84   :  { %1414 = vmatmul.mubr.bf16.vlgmr.msra.gmra.mxu1 %v68_v29 }
  0xe3   :  { %v1591_v32 = vpop.f32.mrf.mxu0 }
  0xe4   :  { %v1613_v33 = vpop.f32.mrf.mxu1 }
  0xe5   :  { %v1592_v35 = vpop.f32.mrf.mxu0 }
  0xe6   :  { %v1614_v36 = vpop.f32.mrf.mxu1  ;;  %v1593_v37 = vadd.f32 %v1592_v35, %v1591_v32 }
  0xe7   :  { %v1615_v38 = vadd.f32 %v1614_v36, %v1613_v33  ;;  %v1594_v39 = vpop.f32.mrf.mxu0 }
  0xe8   :  { %v1616_v40 = vpop.f32.mrf.mxu1  ;;  %v1136_v41 = vadd.f32 %v1593_v37, %v1445_v34 }
  0xe9   :  { %v1595_v42 = vpop.f32.mrf.mxu0 }
  0xea   :  { %v1617_v43 = vpop.f32.mrf.mxu1  ;;  %v1176_v44 = vadd.f32 %v1615_v38, %v1136_v41 }
 0x103   :  { %v1635_v45 = vpop.f32.mrf.mxu0 }
 0x104   :  { %v1657_v46 = vpop.f32.mrf.mxu1 }
 0x105   :  { %v1636_v47 = vpop.f32.mrf.mxu0 }
 0x106   :  { %v1658_v48 = vpop.f32.mrf.mxu1  ;;  %v1637_v61 = vadd.f32 %v1636_v47, %v1635_v45 }
 0x107   :  { %v1638_v49 = vpop.f32.mrf.mxu0  ;;  %v1659_v63 = vadd.f32 %v1658_v48, %v1657_v46 }
 0x108   :  { %v1660_v50 = vpop.f32.mrf.mxu1  ;;  %v1216_v62 = vadd.f32 %v1637_v61, %v1176_v44 }
 0x109   :  { %v1639_v51 = vpop.f32.mrf.mxu0 }
 0x10a   :  { %v1661_v52 = vpop.f32.mrf.mxu1  ;;  %v1256_v1 = vadd.f32 %v1659_v63, %v1216_v62 }
 0x123   :  { %v1679_v53 = vpop.f32.mrf.mxu0 }
 0x124   :  { %v1701_v54 = vpop.f32.mrf.mxu1 }
 0x125   :  { %v1680_v55 = vpop.f32.mrf.mxu0 }
 0x126   :  { %v1702_v56 = vpop.f32.mrf.mxu1  ;;  %v1681_v0 = vadd.f32 %v1680_v55, %v1679_v53 }
 0x127   :  { %v1682_v57 = vpop.f32.mrf.mxu0  ;;  %v1703_v3 = vadd.f32 %v1702_v56, %v1701_v54 }
 0x128   :  { %v1704_v58 = vpop.f32.mrf.mxu1  ;;  %v1296_v2 = vadd.f32 %v1681_v0, %v1256_v1 }
 0x129   :  { %v1683_v59 = vpop.f32.mrf.mxu0 }
 0x12a   :  { %v1705_v60 = vpop.f32.mrf.mxu1  ;;  %v1336_v8 = vadd.f32 %v1703_v3, %v1296_v2 }
 0x143   :  { %v1723_v4 = vpop.f32.mrf.mxu0 }
 0x144   :  { %v1745_v5 = vpop.f32.mrf.mxu1 }
 0x145   :  { %v1724_v6 = vpop.f32.mrf.mxu0 }
 0x146   :  { %v1746_v7 = vpop.f32.mrf.mxu1  ;;  %v1725_v9 = vadd.f32 %v1724_v6, %v1723_v4 }
 0x147   :  { %v1726_v10 = vpop.f32.mrf.mxu0  ;;  %v1747_v13 = vadd.f32 %v1746_v7, %v1745_v5 }
 0x148   :  { %v1748_v11 = vpop.f32.mrf.mxu1  ;;  %v1376_v12 = vadd.f32 %v1725_v9, %v1336_v8 }
 0x149   :  { %v1727_v14 = vpop.f32.mrf.mxu0 }
 0x14a   :  { %v1749_v15 = vpop.f32.mrf.mxu1  ;;  %v1416_v16 = vadd.f32 %v1747_v13, %v1376_v12 }
 0x14c   :  { %v1422_v17 = vmul.f32 0.2, %v1416_v16  ;;  %vm1421_vm0 = vcmp.ge.f32.partialorder %v1416_v16, 0.0 }
 0x14e   :  { %v1423_v19 = vsel %vm1421_vm0, %v1416_v16, %v1422_v17 }
 0x14f   :  { %v1431_v20 = vmul.f32 %v1574_v18, %v1423_v19 }
 0x151   :  { %v1433_v21 = vsel %vm1432_vm1, %v1431_v20, 0.0 }
 0x152   :  { %1434 = vadd.xlane.f32.xlu0 %v1433_v21 }
 0x1db   :  { %v1435_v23 = vpop.xlane.xlu0 %1434 }
 0x1dc   :  { %v1438_v24 = vadd.f32 %v1437_v22, %v1435_v23 }
 0x1de   :  { %1440 = vst.msk [vmem:[%s2342_s5] sm:$0xf] %vm1439_vm2, %v1438_v24 }

</bundles_post_ra>
